<compile_context>
chip_gen: v6e
topology: v6e:2x2x1
jax: 0.10.0
libtpu: 0.0.40
codegen_flags: <defaults>
</compile_context>

<pallas_src>
import functools

import numpy as np
import jax
import jax.numpy as jnp
from jax.experimental import pallas as pl
from jax.experimental.pallas import tpu as pltpu

NUM_NODE_FEATURES = 5
K_FEATURES = 122
TILE = 512            # node-row / contraction tile (multiple of 128)
LANE = 128            # pad hidden / output feature dims to a full lane
Y1_RESIDENT_BYTES = 4 * 1024 * 1024   # keep Y1 VMEM-resident if it fits this


def _round_up(v, m):
    return ((v + m - 1) // m) * m


# ---------------------------------------------------------------------------
# Fused kernel: for each nonzero A tile (row i, col k) of the flattened grid
#   acc += A[i,k] @ Y1[k]
#   (last k of row i)   h = relu(acc + b1);  z += PA[:, i] @ h
#   (very last step)    out = (z @ W2 + b2) @ W3^T + b3
# ---------------------------------------------------------------------------
def _gcn_fused_kernel(rows_ref, cols_ref,                    # scalar prefetch (SMEM)
                      a_ref, y_ref, pa_ref,
                      b1_ref, w2_ref, b2_ref, w3t_ref, b3_ref,
                      out_ref,
                      acc_ref, z_ref,
                      *, y_resident, tile):
    s = pl.program_id(0)
    n_steps = pl.num_programs(0)
    row = rows_ref[s]

    @pl.when(s == 0)
    def _():
        z_ref[...] = jnp.zeros_like(z_ref)

    prev_row = rows_ref[jnp.maximum(s - 1, 0)]
    is_first_k = jnp.logical_or(s == 0, prev_row != row)

    @pl.when(is_first_k)
    def _():
        acc_ref[...] = jnp.zeros_like(acc_ref)

    if y_resident:
        start = pl.multiple_of(cols_ref[s] * tile, tile)
        y_tile = y_ref[pl.ds(start, tile), :]
    else:
        y_tile = y_ref[...]

    acc_ref[...] += jnp.dot(a_ref[...], y_tile,
                            preferred_element_type=jnp.float32)

    next_row = rows_ref[jnp.minimum(s + 1, n_steps - 1)]
    is_last_k = jnp.logical_or(s == n_steps - 1, next_row != row)

    @pl.when(is_last_k)
    def _():
        # Padded node rows become relu(b1) != 0, but PA's padded columns are
        # zero, so they do not contribute to the pooled accumulator.
        h = jnp.maximum(acc_ref[...] + b1_ref[...], 0.0)
        z_ref[...] += jnp.dot(pa_ref[...], h, preferred_element_type=jnp.float32)

    @pl.when(s == n_steps - 1)
    def _():
        pooled = jnp.dot(z_ref[...], w2_ref[...],
                         preferred_element_type=jnp.float32) + b2_ref[...]
        out_ref[...] = (jnp.dot(pooled, w3t_ref[...],
                                preferred_element_type=jnp.float32) + b3_ref[...])


# ---------------------------------------------------------------------------
# Wrapper
# ---------------------------------------------------------------------------
def gcn_forward(x, edge_index, batch_vec, params, num_graphs):
    """x: (N, F) f32, edge_index: (2, E) i32, batch_vec: (N,) i32."""
    w1, b1, w2, b2, w3, b3 = params
    n, f = x.shape
    hidden = w1.shape[1]

    hp = _round_up(hidden, LANE)            # padded hidden
    kp = _round_up(K_FEATURES, LANE)        # padded output features
    npad = _round_up(max(n, 1), TILE)       # padded node count
    gp = _round_up(max(num_graphs, 1), 8)   # padded graph count (sublane)

    n_row_tiles = npad // TILE
    n_k_tiles = npad // TILE

    # ---- plain-JAX glue: normalized adjacency built directly at padded size ----
    src, dst = edge_index[0], edge_index[1]
    adj = jnp.zeros((npad, npad), jnp.float32).at[dst, src].add(1.0)
    diag = jnp.arange(n)
    adj = adj.at[diag, diag].add(1.0)                         # self loops (real nodes only)
    deg = adj.sum(axis=1)
    dinv = jnp.where(deg > 0, jax.lax.rsqrt(deg), 0.0)
    a_norm = dinv[:, None] * adj * dinv[None, :]              # (npad, npad) f32, pads are 0
    a_pad = a_norm.astype(jnp.bfloat16)

    # ---- mean-pool folded with A_norm:  PA = P @ A_norm, via segment row-sum ----
    counts = jax.ops.segment_sum(jnp.ones((n,), jnp.float32), batch_vec,
                                 num_segments=num_graphs)
    pa = jax.ops.segment_sum(a_norm[:n, :], batch_vec,
                             num_segments=num_graphs) / jnp.maximum(counts, 1.0)[:, None]
    pa_pad = jnp.zeros((gp, npad), jnp.float32).at[:num_graphs, :].set(pa)   # keep f32

    # ---- projection Y1 = X @ W1 in plain XLA (K=5 matmul, not worth a launch) ----
    y1 = jnp.zeros((npad, hp), jnp.float32).at[:n, :hidden].set(x @ w1)
    y1_pad = y1.astype(jnp.bfloat16)

    # ---- padded parameters ----
    b1p = jnp.zeros((1, hp), jnp.float32).at[0, :hidden].set(b1)
    w2p = jnp.zeros((hp, hp), jnp.float32).at[:hidden, :hidden].set(w2)
    b2p = jnp.zeros((1, hp), jnp.float32).at[0, :hidden].set(b2)
    w3tp = jnp.zeros((hp, kp), jnp.float32).at[:hidden, :K_FEATURES].set(w3.T)
    b3p = jnp.zeros((1, kp), jnp.float32).at[0, :K_FEATURES].set(b3)

    # ---- host-side nonzero-tile list (O(E), exact, block-diagonal aware) ----
    src_np = np.asarray(edge_index[0])
    dst_np = np.asarray(edge_index[1])
    rows_np = np.concatenate([dst_np, np.arange(n)]) // TILE
    cols_np = np.concatenate([src_np, np.arange(n)]) // TILE
    mask = np.zeros((n_row_tiles, n_k_tiles), dtype=bool)
    mask[rows_np, cols_np] = True
    tile_rows, tile_cols = np.nonzero(mask)   # row-major: k tiles of a row are consecutive
    n_steps = int(tile_rows.size)
    assert n_steps > 0
    n_rows_visited = int(np.unique(tile_rows).size)
    rows_arr = jnp.asarray(tile_rows, jnp.int32)
    cols_arr = jnp.asarray(tile_cols, jnp.int32)

    # ---- Y1 residency gate + VMEM budget from actual footprint ----
    y1_bytes = npad * hp * 2
    y_resident = y1_bytes <= Y1_RESIDENT_BYTES

    buf = 2  # default double buffering
    footprint = (TILE * TILE * 2 * buf                                  # A tile
                 + (y1_bytes if y_resident else TILE * hp * 2) * buf    # Y1
                 + gp * TILE * 4 * buf                                  # PA tile
                 + (hp * hp + hp * kp + 3 * hp + kp) * 4 * buf          # weights/biases
                 + gp * kp * 4 * buf                                    # out
                 + (TILE * hp + gp * hp) * 4)                           # scratch
    vmem_limit = min(max(int(footprint * 1.5) + (2 << 20), 16 << 20), 48 << 20)

    flops = ((2 * TILE * TILE * hp) * n_steps
             + (2 * gp * TILE * hp) * n_rows_visited
             + 2 * gp * hp * hp + 2 * gp * hp * kp)
    bytes_accessed = (n_steps * TILE * TILE * 2
                      + (y1_bytes if y_resident else n_steps * TILE * hp * 2)
                      + n_rows_visited * gp * TILE * 4
                      + (hp * hp + hp * kp + 3 * hp + kp) * 4
                      + gp * kp * 4)

    y_spec = (pl.BlockSpec((npad, hp), lambda s, r, c: (0, 0)) if y_resident
              else pl.BlockSpec((TILE, hp), lambda s, r, c: (c[s], 0)))

    kernel_fn = functools.partial(_gcn_fused_kernel, y_resident=y_resident, tile=TILE)

    out_pad = pl.pallas_call(
        kernel_fn,
        grid_spec=pltpu.PrefetchScalarGridSpec(
            num_scalar_prefetch=2,
            grid=(n_steps,),
            in_specs=[
                pl.BlockSpec((TILE, TILE), lambda s, r, c: (r[s], c[s])),   # A
                y_spec,                                                     # Y1
                pl.BlockSpec((gp, TILE), lambda s, r, c: (0, r[s])),        # PA
                pl.BlockSpec((1, hp), lambda s, r, c: (0, 0)),              # b1
                pl.BlockSpec((hp, hp), lambda s, r, c: (0, 0)),             # W2
                pl.BlockSpec((1, hp), lambda s, r, c: (0, 0)),              # b2
                pl.BlockSpec((hp, kp), lambda s, r, c: (0, 0)),             # W3^T
                pl.BlockSpec((1, kp), lambda s, r, c: (0, 0)),              # b3
            ],
            out_specs=pl.BlockSpec((gp, kp), lambda s, r, c: (0, 0)),
            scratch_shapes=[pltpu.VMEM((TILE, hp), jnp.float32),   # per-row-tile acc
                            pltpu.VMEM((gp, hp), jnp.float32)],    # pooled acc
        ),
        out_shape=jax.ShapeDtypeStruct((gp, kp), jnp.float32),
        compiler_params=pltpu.CompilerParams(
            dimension_semantics=("arbitrary",),   # cross-step accumulator: v7x-safe
            vmem_limit_bytes=vmem_limit),
        cost_estimate=pl.CostEstimate(flops=int(flops), transcendentals=0,
                                      bytes_accessed=int(bytes_accessed)),
    )(rows_arr, cols_arr, a_pad, y1_pad, pa_pad, b1p, w2p, b2p, w3tp, b3p)

    # dropout (eval mode) == identity; slice away padding
    return out_pad[:num_graphs, :K_FEATURES]


# ---------------------------------------------------------------------------
# Pure-JAX reference (sanity check) and params
# ---------------------------------------------------------------------------
def _reference_forward(x, edge_index, batch_vec, params, num_graphs):
    w1, b1, w2, b2, w3, b3 = params
    n = x.shape[0]
    src, dst = edge_index[0], edge_index[1]
    adj = jnp.zeros((n, n), jnp.float32).at[dst, src].add(1.0)
    adj = adj + jnp.eye(n, dtype=jnp.float32)
    deg = adj.sum(axis=1)
    dinv = jnp.where(deg > 0, 1.0 / jnp.sqrt(deg), 0.0)
    a_norm = dinv[:, None] * adj * dinv[None, :]
    h1 = jnp.maximum(a_norm @ (x @ w1) + b1, 0.0)
    h2 = a_norm @ (h1 @ w2) + b2
    one_hot = (batch_vec[None, :] == jnp.arange(num_graphs)[:, None]).astype(jnp.float32)
    counts = jnp.maximum(one_hot.sum(axis=1, keepdims=True), 1.0)
    pooled = (one_hot / counts) @ h2
    return pooled @ w3.T + b3


def init_params(key, hidden_channels):
    k1, k2, k3 = jax.random.split(key, 3)
    w1 = jax.random.normal(k1, (NUM_NODE_FEATURES, hidden_channels), jnp.float32) * 0.2
    b1 = jnp.zeros((hidden_channels,), jnp.float32)
    w2 = jax.random.normal(k2, (hidden_channels, hidden_channels), jnp.float32) * 0.1
    b2 = jnp.zeros((hidden_channels,), jnp.float32)
    w3 = jax.random.normal(k3, (K_FEATURES, hidden_channels), jnp.float32) * 0.1
    b3 = jnp.zeros((K_FEATURES,), jnp.float32)
    return (w1, b1, w2, b2, w3, b3)


if __name__ == "__main__":
    key = jax.random.PRNGKey(0)
    hidden_channels = 32
    num_graphs = 2
    nodes_per_graph = 8
    n = num_graphs * nodes_per_graph

    kx, kp = jax.random.split(key)
    x = jax.random.normal(kx, (n, NUM_NODE_FEATURES), jnp.float32)

    # each graph is an undirected ring over its 8 nodes
    srcs, dsts = [], []
    for g in range(num_graphs):
        base = g * nodes_per_graph
        for i in range(nodes_per_graph):
            a = base + i
            b = base + (i + 1) % nodes_per_graph
            srcs += [a, b]
            dsts += [b, a]
    edge_index = jnp.array([srcs, dsts], dtype=jnp.int32)
    batch_vec = jnp.repeat(jnp.arange(num_graphs, dtype=jnp.int32), nodes_per_graph)

    params = init_params(kp, hidden_channels)

    out = gcn_forward(x, edge_index, batch_vec, params, num_graphs)
    jax.block_until_ready(out)
    assert out.shape == (num_graphs, K_FEATURES)

    ref = _reference_forward(x, edge_index, batch_vec, params, num_graphs)
    max_err = float(jnp.max(jnp.abs(out - ref)))
    assert max_err < 5e-2, f"max abs err {max_err}"

    print("KERNEL_OK")
</pallas_src>

<mosaic_0001>
module attributes {stable_mosaic.version = 11 : i64} {
  func.func @_gcn_fused_kernel(%arg0: i32, %arg1: memref<1xi32, #tpu.memory_space<smem>>, %arg2: memref<1xi32, #tpu.memory_space<smem>>, %arg3: memref<512x512xbf16, #tpu.memory_space<vmem>>, %arg4: memref<512x128xbf16, #tpu.memory_space<vmem>>, %arg5: memref<8x512xf32, #tpu.memory_space<vmem>>, %arg6: memref<1x128xf32, #tpu.memory_space<vmem>>, %arg7: memref<128x128xf32, #tpu.memory_space<vmem>>, %arg8: memref<1x128xf32, #tpu.memory_space<vmem>>, %arg9: memref<128x128xf32, #tpu.memory_space<vmem>>, %arg10: memref<1x128xf32, #tpu.memory_space<vmem>>, %arg11: memref<8x128xf32, #tpu.memory_space<vmem>>, %arg12: memref<512x128xf32, #tpu.memory_space<vmem>>, %arg13: memref<8x128xf32, #tpu.memory_space<vmem>>) attributes {dimension_semantics = [#tpu.dimension_semantics<arbitrary>], iteration_bounds = array<i64: 1>, scalar_prefetch = 2 : i64, scratch_operands = 2 : i64, tpu.core_type = #tpu.core_type<tc>, window_params = [{transform_indices = @transform_0, window_bounds = array<i64: 512, 512>}, {pipeline_mode = #tpu.pipeline_mode<synchronous>, transform_indices = @transform_1, window_bounds = array<i64: 512, 128>}, {transform_indices = @transform_2, window_bounds = array<i64: 8, 512>}, {pipeline_mode = #tpu.pipeline_mode<synchronous>, transform_indices = @transform_3, window_bounds = array<i64: 1, 128>}, {pipeline_mode = #tpu.pipeline_mode<synchronous>, transform_indices = @transform_4, window_bounds = array<i64: 128, 128>}, {pipeline_mode = #tpu.pipeline_mode<synchronous>, transform_indices = @transform_5, window_bounds = array<i64: 1, 128>}, {pipeline_mode = #tpu.pipeline_mode<synchronous>, transform_indices = @transform_6, window_bounds = array<i64: 128, 128>}, {pipeline_mode = #tpu.pipeline_mode<synchronous>, transform_indices = @transform_7, window_bounds = array<i64: 1, 128>}, {pipeline_mode = #tpu.pipeline_mode<synchronous>, transform_indices = @transform_8, window_bounds = array<i64: 8, 128>}]} {
    %0 = arith.index_cast %arg0 : i32 to index
    %1 = memref.load %arg1[%0] : memref<1xi32, #tpu.memory_space<smem>>
    %c0_i32 = arith.constant 0 : i32
    %2 = arith.cmpi eq, %arg0, %c0_i32 : i32
    %3 = arith.extui %2 : i1 to i32
    %c0_i32_0 = arith.constant 0 : i32
    %4 = arith.cmpi ne, %3, %c0_i32_0 : i32
    scf.if %4 {
      %cst_16 = arith.constant 0.000000e+00 : f32
      %37 = vector.broadcast %cst_16 : f32 to vector<8x128xf32>
      %c0_17 = arith.constant 0 : index
      %c0_18 = arith.constant 0 : index
      %38 = vector.load %arg13[%c0_17, %c0_18] : memref<8x128xf32, #tpu.memory_space<vmem>>, vector<8x128xf32>
      tpu.vector_store %arg13[%c0_17, %c0_18], %37 {strides = array<i32>} : memref<8x128xf32, #tpu.memory_space<vmem>>, vector<8x128xf32>,
    } else {
    }
    %c1_i32 = arith.constant 1 : i32
    %5 = arith.subi %arg0, %c1_i32 : i32
    %c0_i32_1 = arith.constant 0 : i32
    %6 = arith.maxsi %5, %c0_i32_1 : i32
    %7 = arith.index_cast %6 : i32 to index
    %8 = memref.load %arg1[%7] : memref<1xi32, #tpu.memory_space<smem>>
    %c0_i32_2 = arith.constant 0 : i32
    %9 = arith.cmpi eq, %arg0, %c0_i32_2 : i32
    %10 = arith.cmpi ne, %8, %1 : i32
    %11 = arith.ori %9, %10 : i1
    %12 = arith.extui %11 : i1 to i32
    %c0_i32_3 = arith.constant 0 : i32
    %13 = arith.cmpi ne, %12, %c0_i32_3 : i32
    scf.if %13 {
      %cst_16 = arith.constant 0.000000e+00 : f32
      %37 = vector.broadcast %cst_16 : f32 to vector<512x128xf32>
      %c0_17 = arith.constant 0 : index
      %c0_18 = arith.constant 0 : index
      %38 = vector.load %arg12[%c0_17, %c0_18] : memref<512x128xf32, #tpu.memory_space<vmem>>, vector<512x128xf32>
      tpu.vector_store %arg12[%c0_17, %c0_18], %37 {strides = array<i32>} : memref<512x128xf32, #tpu.memory_space<vmem>>, vector<512x128xf32>,
    } else {
    }
    %14 = arith.index_cast %arg0 : i32 to index
    %15 = memref.load %arg2[%14] : memref<1xi32, #tpu.memory_space<smem>>
    %c512_i32 = arith.constant 512 : i32
    %16 = arith.muli %15, %c512_i32 : i32
    %17 = tpu.assume_multiple %16, 512 : i32
    %18 = arith.index_cast %17 : i32 to index
    %c0 = arith.constant 0 : index
    %19 = vector.load %arg4[%18, %c0] : memref<512x128xbf16, #tpu.memory_space<vmem>>, vector<512x128xbf16>
    %c0_4 = arith.constant 0 : index
    %c0_5 = arith.constant 0 : index
    %20 = vector.load %arg12[%c0_4, %c0_5] : memref<512x128xf32, #tpu.memory_space<vmem>>, vector<512x128xf32>
    %c0_6 = arith.constant 0 : index
    %c0_7 = arith.constant 0 : index
    %21 = vector.load %arg3[%c0_6, %c0_7] : memref<512x512xbf16, #tpu.memory_space<vmem>>, vector<512x512xbf16>
    %cst = arith.constant dense<0.000000e+00> : vector<512x128xf32>
    %22 = tpu.matmul %21, %19, %cst {dimension_numbers = #tpu.dot_dimension_numbers<[1], [0], [0], [1], [0, 0, 1, 1], [], []>} : vector<512x512xbf16>, vector<512x128xbf16>, vector<512x128xf32> -> vector<512x128xf32>
    %23 = arith.addf %20, %22 : vector<512x128xf32>
    %c0_8 = arith.constant 0 : index
    %c0_9 = arith.constant 0 : index
    %24 = vector.load %arg12[%c0_8, %c0_9] : memref<512x128xf32, #tpu.memory_space<vmem>>, vector<512x128xf32>
    tpu.vector_store %arg12[%c0_8, %c0_9], %23 {strides = array<i32>} : memref<512x128xf32, #tpu.memory_space<vmem>>, vector<512x128xf32>,
    %c1_i32_10 = arith.constant 1 : i32
    %25 = arith.addi %arg0, %c1_i32_10 : i32
    %c0_i32_11 = arith.constant 0 : i32
    %26 = arith.minsi %25, %c0_i32_11 : i32
    %27 = arith.index_cast %26 : i32 to index
    %28 = memref.load %arg1[%27] : memref<1xi32, #tpu.memory_space<smem>>
    %c0_i32_12 = arith.constant 0 : i32
    %29 = arith.cmpi eq, %arg0, %c0_i32_12 : i32
    %30 = arith.cmpi ne, %28, %1 : i32
    %31 = arith.ori %29, %30 : i1
    %32 = arith.extui %31 : i1 to i32
    %c0_i32_13 = arith.constant 0 : i32
    %33 = arith.cmpi ne, %32, %c0_i32_13 : i32
    scf.if %33 {
      %c0_16 = arith.constant 0 : index
      %c0_17 = arith.constant 0 : index
      %37 = vector.load %arg12[%c0_16, %c0_17] : memref<512x128xf32, #tpu.memory_space<vmem>>, vector<512x128xf32>
      %c0_18 = arith.constant 0 : index
      %c0_19 = arith.constant 0 : index
      %38 = vector.load %arg6[%c0_18, %c0_19] : memref<1x128xf32, #tpu.memory_space<vmem>>, vector<1x128xf32>
      %39 = vector.broadcast %38 : vector<1x128xf32> to vector<512x128xf32>
      %40 = arith.addf %37, %39 : vector<512x128xf32>
      %cst_20 = arith.constant 0.000000e+00 : f32
      %41 = vector.broadcast %cst_20 : f32 to vector<512x128xf32>
      %42 = arith.maximumf %40, %41 : vector<512x128xf32>
      %c0_21 = arith.constant 0 : index
      %c0_22 = arith.constant 0 : index
      %43 = vector.load %arg13[%c0_21, %c0_22] : memref<8x128xf32, #tpu.memory_space<vmem>>, vector<8x128xf32>
      %c0_23 = arith.constant 0 : index
      %c0_24 = arith.constant 0 : index
      %44 = vector.load %arg5[%c0_23, %c0_24] : memref<8x512xf32, #tpu.memory_space<vmem>>, vector<8x512xf32>
      %cst_25 = arith.constant dense<0.000000e+00> : vector<8x128xf32>
      %45 = tpu.matmul %44, %42, %cst_25 {dimension_numbers = #tpu.dot_dimension_numbers<[1], [0], [0], [1], [0, 0, 1, 1], [], []>} : vector<8x512xf32>, vector<512x128xf32>, vector<8x128xf32> -> vector<8x128xf32>
      %46 = arith.addf %43, %45 : vector<8x128xf32>
      %c0_26 = arith.constant 0 : index
      %c0_27 = arith.constant 0 : index
      %47 = vector.load %arg13[%c0_26, %c0_27] : memref<8x128xf32, #tpu.memory_space<vmem>>, vector<8x128xf32>
      tpu.vector_store %arg13[%c0_26, %c0_27], %46 {strides = array<i32>} : memref<8x128xf32, #tpu.memory_space<vmem>>, vector<8x128xf32>,
    } else {
    }
    %c0_i32_14 = arith.constant 0 : i32
    %34 = arith.cmpi eq, %arg0, %c0_i32_14 : i32
    %35 = arith.extui %34 : i1 to i32
    %c0_i32_15 = arith.constant 0 : i32
    %36 = arith.cmpi ne, %35, %c0_i32_15 : i32
    scf.if %36 {
      %c0_16 = arith.constant 0 : index
      %c0_17 = arith.constant 0 : index
      %37 = vector.load %arg13[%c0_16, %c0_17] : memref<8x128xf32, #tpu.memory_space<vmem>>, vector<8x128xf32>
      %c0_18 = arith.constant 0 : index
      %c0_19 = arith.constant 0 : index
      %38 = vector.load %arg7[%c0_18, %c0_19] : memref<128x128xf32, #tpu.memory_space<vmem>>, vector<128x128xf32>
      %cst_20 = arith.constant dense<0.000000e+00> : vector<8x128xf32>
      %39 = tpu.matmul %37, %38, %cst_20 {dimension_numbers = #tpu.dot_dimension_numbers<[1], [0], [0], [1], [0, 0, 1, 1], [], []>} : vector<8x128xf32>, vector<128x128xf32>, vector<8x128xf32> -> vector<8x128xf32>
      %c0_21 = arith.constant 0 : index
      %c0_22 = arith.constant 0 : index
      %40 = vector.load %arg8[%c0_21, %c0_22] : memref<1x128xf32, #tpu.memory_space<vmem>>, vector<1x128xf32>
      %41 = vector.broadcast %40 : vector<1x128xf32> to vector<8x128xf32>
      %42 = arith.addf %39, %41 : vector<8x128xf32>
      %c0_23 = arith.constant 0 : index
      %c0_24 = arith.constant 0 : index
      %43 = vector.load %arg9[%c0_23, %c0_24] : memref<128x128xf32, #tpu.memory_space<vmem>>, vector<128x128xf32>
      %cst_25 = arith.constant dense<0.000000e+00> : vector<8x128xf32>
      %44 = tpu.matmul %42, %43, %cst_25 {dimension_numbers = #tpu.dot_dimension_numbers<[1], [0], [0], [1], [0, 0, 1, 1], [], []>} : vector<8x128xf32>, vector<128x128xf32>, vector<8x128xf32> -> vector<8x128xf32>
      %c0_26 = arith.constant 0 : index
      %c0_27 = arith.constant 0 : index
      %45 = vector.load %arg10[%c0_26, %c0_27] : memref<1x128xf32, #tpu.memory_space<vmem>>, vector<1x128xf32>
      %46 = vector.broadcast %45 : vector<1x128xf32> to vector<8x128xf32>
      %47 = arith.addf %44, %46 : vector<8x128xf32>
      %c0_28 = arith.constant 0 : index
      %c0_29 = arith.constant 0 : index
      %48 = vector.load %arg11[%c0_28, %c0_29] : memref<8x128xf32, #tpu.memory_space<vmem>>, vector<8x128xf32>
      tpu.vector_store %arg11[%c0_28, %c0_29], %47 {strides = array<i32>} : memref<8x128xf32, #tpu.memory_space<vmem>>, vector<8x128xf32>,
    } else {
    }
    return
  }
  func.func @transform_0(%arg0: i32, %arg1: memref<1xi32, #tpu.memory_space<smem>>, %arg2: memref<1xi32, #tpu.memory_space<smem>>) -> (i32, i32) {
    %0 = arith.index_cast %arg0 : i32 to index
    %1 = memref.load %arg1[%0] : memref<1xi32, #tpu.memory_space<smem>>
    %2 = arith.index_cast %arg0 : i32 to index
    %3 = memref.load %arg2[%2] : memref<1xi32, #tpu.memory_space<smem>>
    %c0_i32 = arith.constant 0 : i32
    return %1, %3 : i32, i32
  }
  func.func @transform_1(%arg0: i32, %arg1: memref<1xi32, #tpu.memory_space<smem>>, %arg2: memref<1xi32, #tpu.memory_space<smem>>) -> (i32, i32) {
    %c0_i32 = arith.constant 0 : i32
    %c0_i32_0 = arith.constant 0 : i32
    %c0_i32_1 = arith.constant 0 : i32
    return %c0_i32, %c0_i32_0 : i32, i32
  }
  func.func @transform_2(%arg0: i32, %arg1: memref<1xi32, #tpu.memory_space<smem>>, %arg2: memref<1xi32, #tpu.memory_space<smem>>) -> (i32, i32) {
    %0 = arith.index_cast %arg0 : i32 to index
    %1 = memref.load %arg1[%0] : memref<1xi32, #tpu.memory_space<smem>>
    %c0_i32 = arith.constant 0 : i32
    %c0_i32_0 = arith.constant 0 : i32
    return %c0_i32, %1 : i32, i32
  }
  func.func @transform_3(%arg0: i32, %arg1: memref<1xi32, #tpu.memory_space<smem>>, %arg2: memref<1xi32, #tpu.memory_space<smem>>) -> (i32, i32) {
    %c0_i32 = arith.constant 0 : i32
    %c0_i32_0 = arith.constant 0 : i32
    %c0_i32_1 = arith.constant 0 : i32
    return %c0_i32, %c0_i32_0 : i32, i32
  }
  func.func @transform_4(%arg0: i32, %arg1: memref<1xi32, #tpu.memory_space<smem>>, %arg2: memref<1xi32, #tpu.memory_space<smem>>) -> (i32, i32) {
    %c0_i32 = arith.constant 0 : i32
    %c0_i32_0 = arith.constant 0 : i32
    %c0_i32_1 = arith.constant 0 : i32
    return %c0_i32, %c0_i32_0 : i32, i32
  }
  func.func @transform_5(%arg0: i32, %arg1: memref<1xi32, #tpu.memory_space<smem>>, %arg2: memref<1xi32, #tpu.memory_space<smem>>) -> (i32, i32) {
    %c0_i32 = arith.constant 0 : i32
    %c0_i32_0 = arith.constant 0 : i32
    %c0_i32_1 = arith.constant 0 : i32
    return %c0_i32, %c0_i32_0 : i32, i32
  }
  func.func @transform_6(%arg0: i32, %arg1: memref<1xi32, #tpu.memory_space<smem>>, %arg2: memref<1xi32, #tpu.memory_space<smem>>) -> (i32, i32) {
    %c0_i32 = arith.constant 0 : i32
    %c0_i32_0 = arith.constant 0 : i32
    %c0_i32_1 = arith.constant 0 : i32
    return %c0_i32, %c0_i32_0 : i32, i32
  }
  func.func @transform_7(%arg0: i32, %arg1: memref<1xi32, #tpu.memory_space<smem>>, %arg2: memref<1xi32, #tpu.memory_space<smem>>) -> (i32, i32) {
    %c0_i32 = arith.constant 0 : i32
    %c0_i32_0 = arith.constant 0 : i32
    %c0_i32_1 = arith.constant 0 : i32
    return %c0_i32, %c0_i32_0 : i32, i32
  }
  func.func @transform_8(%arg0: i32, %arg1: memref<1xi32, #tpu.memory_space<smem>>, %arg2: memref<1xi32, #tpu.memory_space<smem>>) -> (i32, i32) {
    %c0_i32 = arith.constant 0 : i32
    %c0_i32_0 = arith.constant 0 : i32
    %c0_i32_1 = arith.constant 0 : i32
    return %c0_i32, %c0_i32_0 : i32, i32
  }
}

</mosaic_0001>

<bundles_post_ra>
// kernel: tpu_custom_call.1
= control target key start
LH: loop header
LB: loop body
LE: loop exit
PB: predicated region body
PF: predicated region fallthrough
CT: control target
= control target key end

     0   :  { %17 = vsyncpa [#allocation8], 0  ;;  %s3749_s0 = inlined_call_operand.<no memory space> [shape: s32[1], index: 0, kind: input, shape index: {}]   ;;  %s3750_s1 = inlined_call_operand.<no memory space> [shape: s32[1], index: 1, kind: input, shape index: {}]   ;;  %s3751_s2 = inlined_call_operand.hbm [shape: bf16[512,512], index: 2, kind: input, shape index: {}]   ;;  %s3752_s3 = inlined_call_operand.hbm [shape: bf16[512,128], index: 3, kind: input, shape index: {}]   ;;  %s3753_s4 = inlined_call_operand.hbm [shape: f32[8,512], index: 4, kind: input, shape index: {}]   ;;  %s3754_s5 = inlined_call_operand.vmem [shape: f32[1,128], index: 5, kind: input, shape index: {}]   ;;  %s3755_s6 = inlined_call_operand.hbm [shape: f32[128,128], index: 6, kind: input, shape index: {}]   ;;  %s3756_s7 = inlined_call_operand.vmem [shape: f32[1,128], index: 7, kind: input, shape index: {}]   ;;  %s3757_s8 = inlined_call_operand.hbm [shape: f32[128,128], index: 8, kind: input, shape index: {}]   ;;  %s3758_s9 = inlined_call_operand.vmem [shape: f32[1,128], index: 9, kind: input, shape index: {}]   ;;  %s3759_s10 = inlined_call_operand.hbm [shape: f32[8,128], index: 10, kind: output, shape index: {}]  }
   0x1   :  { %18 = vsyncpa [#allocation11], 0 }
   0x2   :  { %19 = vsyncpa [#allocation14], 0 }
   0x3   :  { %20 = vsyncpa [#allocation9], 0  ;;  %s3288_s13 = smov [#allocation10]  }
   0x4   :  { %s46_s14 = sshll.u32 %s3288_s13, 4  ;;  %s47_s14 = int_to_ptr.vmem [resolvable:$true] %s46_s14 }
   0x5   :  { %s3164_s15 = scalar_lea.vmem %s47_s14, 4096  ;;  %p3169_p1 = scmp.lt.s32.totalorder %s47_s14, %s47_s14 }
   0x6   :  { %p3165_p0 = scmp.ne.s32.totalorder %s47_s14, %s3164_s15  ;;  %p3170_p2 = scmp.lt.s32.totalorder %s3164_s15, %s3164_s15 }
   0x8   :  { %p3171_p3 = por %p3170_p2, %p3169_p1 }
   0xa   :  { %p3172_p4 = pnand %p3171_p3, %p3165_p0 }
   0xc   :  { %3175 = shalt.err (!%p3172_p4)
}
   0xd   :  { %s3289_s16 = smov 64   ;;  %s3290_s17 = smov 4  }
   0xe   :  { %52 = dma.hbm_to_vmem [thread:$0]  %s3752_s3, 4096, %s47_s14, [#allocation11], %s3289_s16, %s3289_s16, %s3290_s17  }
   0xf   :  { %s3291_s20 = smov [#allocation13]  }
  0x10   :  { %s74_s21 = sshll.u32 %s3291_s20, 4  ;;  %s75_s21 = int_to_ptr.vmem [resolvable:$true] %s74_s21 }
  0x11   :  { %s3184_s22 = scalar_lea.vmem %s75_s21, 2048  ;;  %p3189_p6 = scmp.lt.s32.totalorder %s75_s21, %s75_s21 }
  0x12   :  { %p3185_p5 = scmp.ne.s32.totalorder %s75_s21, %s3184_s22  ;;  %p3190_p7 = scmp.lt.s32.totalorder %s3184_s22, %s3184_s22 }
  0x14   :  { %p3191_p8 = por %p3190_p7, %p3189_p6 }
  0x16   :  { %p3192_p9 = pnand %p3191_p8, %p3185_p5 }
  0x18   :  { %3195 = shalt.err (!%p3192_p9)
}
  0x19   :  { %s3292_s23 = smov 128   ;;  %s3293_s24 = smov 8  }
  0x1a   :  { %80 = dma.hbm_to_vmem [thread:$0]  %s3755_s6, 2048, %s75_s21, [#allocation14], %s3292_s23, %s3292_s23, %s3293_s24  }
  0x1b   :  { %s2571_s28 = sshll.u32 %s3750_s1, 2  ;;  %s2741_s11 = sshll.u32 %s3749_s0, 8 }
  0x1c   :  { %s31_s12 = sadd.s32 %s2741_s11, %s2571_s28  ;;  %s3294_s14 = smov [#allocation7]  }
  0x1d   :  { %s2573_s13 = sshll.u32 %s31_s12, 6  ;;  %s34_s15 = sshll.u32 %s3294_s14, 4  ;;  %s35_s15 = int_to_ptr.vmem [resolvable:$true] %s34_s15 }
  0x1e   :  { %s33_s18 = scalar_lea.hbm %s3751_s2, %s2573_s13  ;;  %s3198_s21 = scalar_lea.hbm %s3751_s2, 16384 }
  0x1f   :  { %s3196_s19 = scalar_lea.hbm %s33_s18, 16384  ;;  %p3199_p11 = scmp.lt.s32.totalorder %s33_s18, %s3751_s2 }
  0x20   :  { %p3197_p10 = scmp.ne.s32.totalorder %s33_s18, %s3196_s19  ;;  %p3200_p12 = scmp.lt.s32.totalorder %s3198_s21, %s3196_s19 }
  0x22   :  { %p3201_p13 = por %p3200_p12, %p3199_p11 }
  0x24   :  { %p3202_p0 = pnand %p3201_p13, %p3197_p10 }
  0x26   :  { %3205 = shalt.err (!%p3202_p0)
}
  0x27   :  { %s3206_s26 = scalar_lea.vmem %s35_s15, 16384  ;;  %p3211_p2 = scmp.lt.s32.totalorder %s35_s15, %s35_s15 }
  0x28   :  { %p3207_p1 = scmp.ne.s32.totalorder %s35_s15, %s3206_s26  ;;  %p3212_p3 = scmp.lt.s32.totalorder %s3206_s26, %s3206_s26 }
  0x2a   :  { %p3213_p4 = por %p3212_p3, %p3211_p2 }
  0x2c   :  { %p3214_p5 = pnand %p3213_p4, %p3207_p1 }
  0x2e   :  { %3217 = shalt.err (!%p3214_p5)
}
  0x2f   :  { %s3295_s3 = smov 256   ;;  %s3296_s27 = smov 16  }
  0x30   :  { %40 = dma.hbm_to_vmem [thread:$0]  %s33_s18, 16384, %s35_s15, [#allocation8], %s3295_s3, %s3295_s3, %s3296_s27  }
  0x31   :  { %s2742_s30 = sshll.u32 %s3749_s0, 9  ;;  %s3297_s13 = smov [#allocation12]  }
  0x32   :  { %s61_s12 = scalar_lea.hbm %s3753_s4, %s2742_s30  ;;  %s63_s14 = sshll.u32 %s3297_s13, 4  ;;  %s64_s14 = int_to_ptr.vmem [resolvable:$true] %s63_s14 }
  0x33   :  { %s3218_s16 = scalar_lea.hbm %s61_s12, 512  ;;  %s3220_s6 = scalar_lea.hbm %s3753_s4, 512 }
  0x34   :  { %p3219_p6 = scmp.ne.s32.totalorder %s61_s12, %s3218_s16  ;;  %p3221_p7 = scmp.lt.s32.totalorder %s61_s12, %s3753_s4 }
  0x35   :  { %p3222_p8 = scmp.lt.s32.totalorder %s3220_s6, %s3218_s16 }
  0x37   :  { %p3223_p9 = por %p3222_p8, %p3221_p7 }
  0x39   :  { %p3224_p10 = pnand %p3223_p9, %p3219_p6 }
  0x3b   :  { %3227 = shalt.err (!%p3224_p10)
}
  0x3c   :  { %s3228_s0 = scalar_lea.vmem %s64_s14, 512  ;;  %p3233_p12 = scmp.lt.s32.totalorder %s64_s14, %s64_s14 }
  0x3d   :  { %p3229_p11 = scmp.ne.s32.totalorder %s64_s14, %s3228_s0  ;;  %p3234_p13 = scmp.lt.s32.totalorder %s3228_s0, %s3228_s0 }
  0x3f   :  { %p3235_p0 = por %p3234_p13, %p3233_p12 }
  0x41   :  { %p3236_p1 = pnand %p3235_p0, %p3229_p11 }
  0x43   :  { %3239 = shalt.err (!%p3236_p1)
}
  0x44   :  { %66 = dma.hbm_to_vmem [thread:$0]  %s61_s12, 512, %s64_s14, [#allocation11]  }
  0x45   :  { %s3298_s15 = smov [#allocation15]  }
  0x46   :  { %s88_s18 = sshll.u32 %s3298_s15, 4  ;;  %s89_s18 = int_to_ptr.vmem [resolvable:$true] %s88_s18 }
  0x47   :  { %s3248_s22 = scalar_lea.vmem %s89_s18, 2048  ;;  %p3253_p3 = scmp.lt.s32.totalorder %s89_s18, %s89_s18 }
  0x48   :  { %p3249_p2 = scmp.ne.s32.totalorder %s89_s18, %s3248_s22  ;;  %p3254_p4 = scmp.lt.s32.totalorder %s3248_s22, %s3248_s22 }
  0x4a   :  { %p3255_p5 = por %p3254_p4, %p3253_p3 }
  0x4c   :  { %p3256_p7 = pnand %p3255_p5, %p3249_p2 }
  0x4e   :  { %3259 = shalt.err (!%p3256_p7)
}
  0x4f   :  { %94 = dma.hbm_to_vmem [thread:$0]  %s3757_s8, 2048, %s89_s18, [#allocation14], %s3292_s23, %s3292_s23, %s3293_s24  }
  0x50   :  { %3280 = dma.done.wait [#allocation8], 16384  }
  0x51   :  { %3281 = vsyncadd [#allocation8], 4294950912 }
  0x52   :  { %3282 = dma.done.wait [#allocation11], 4608  }
  0x53   :  { %3283 = vsyncadd [#allocation11], 4294962688 }
  0x54   :  { %3284 = dma.done.wait [#allocation14], 4096  }
  0x55   :  { %3285 = vsyncadd [#allocation14], 4294963200  ;;  %s2576_s27 = sshll.u32 %s3750_s1, 9  ;;  %v3299_v0 = vmov 0   ;;  %v2966_v19 = vld [vmem:[#allocation7 + $0x4] ss:$16 sps:$4 sm:$0xff]  }
  0x56   :  { %1292 = vmatprep.subr.bf16.mxu0 %v3299_v0  ;;  %1581 = vmatprep.subr.bf16.mxu1 %v3299_v0  ;;  %s200_s28 = sshra.s32 %s2576_s27, 3  ;;  %v2969_v21 = vld [vmem:[#allocation7 + $0xc] ss:$16 sps:$4 sm:$0xff]   ;;  %v2964_v35 = vld [vmem:[#allocation7] ss:$16 sps:$4 sm:$0xff]   ;;  %vm3301_vm0 = vmmov 0  }
  0x57   :  { %s2577_s29 = sshll.u32 %s200_s28, 2  ;;  %1324 = vmatprep.mubr.bf16.mxu0 %v2966_v19  ;;  %1613 = vmatprep.mubr.bf16.mxu1 %v2969_v21  ;;  %v2967_v36 = vld [vmem:[#allocation7 + $0x8] ss:$16 sps:$4 sm:$0xff]   ;;  %v2970_v37 = vld [vmem:[#allocation7 + $0x24] ss:$16 sps:$4 sm:$0xff]   ;;  %s3302_s2 = smov [#allocation16]  }
  0x58   :  { %s3405_s30 = scalar_lea.vmem [#allocation10], %s2577_s29  ;;  %v2972_v38 = vld [vmem:[#allocation7 + $0x2c] ss:$16 sps:$4 sm:$0xff]   ;;  %v2974_v39 = vld [vmem:[#allocation7 + $0x20] ss:$16 sps:$4 sm:$0xff]   ;;  %s2550_s12 = sshll.u32 %s3302_s2, 4  ;;  %s2551_s12 = int_to_ptr.vmem [resolvable:$true] %s2550_s12 }
  0x59   :  { %v2932_v1 = vld [vmem:[%s3405_s30 + $0x38] sm:$0xff]   ;;  %v2934_v3 = vld [vmem:[%s3405_s30 + $0x30] sm:$0xff]   ;;  %v2936_v5 = vld [vmem:[%s3405_s30 + $0x28] sm:$0xff]   ;;  %s3260_s13 = scalar_lea.vmem %s2551_s12, 128  ;;  %p3265_p8 = scmp.lt.s32.totalorder %s2551_s12, %s2551_s12 }
  0x5a   :  { %v2933_v2 = vld [vmem:[%s3405_s30 + $0xb8] sm:$0xff]   ;;  %1293 = vmatpush1.bf16.msra.mxu0 %v2932_v1  ;;  %v2935_v4 = vld [vmem:[%s3405_s30 + $0xb0] sm:$0xff]   ;;  %v2937_v6 = vld [vmem:[%s3405_s30 + $0xa8] sm:$0xff]   ;;  %p3261_p6 = scmp.ne.s32.totalorder %s2551_s12, %s3260_s13  ;;  %p3266_p9 = scmp.lt.s32.totalorder %s3260_s13, %s3260_s13 }
  0x5b   :  { %1582 = vmatpush1.bf16.msra.mxu1 %v2933_v2  ;;  %1294 = vmatprep.subr.bf16.mxu0 %v3299_v0  ;;  %v2938_v7 = vld [vmem:[%s3405_s30 + $0x20] sm:$0xff]   ;;  %v2940_v9 = vld [vmem:[%s3405_s30 + $0x18] sm:$0xff]   ;;  %v2942_v11 = vld [vmem:[%s3405_s30 + $0x10] sm:$0xff]  }
  0x5c   :  { %1583 = vmatprep.subr.bf16.mxu1 %v3299_v0  ;;  %v2939_v8 = vld [vmem:[%s3405_s30 + $0xa0] sm:$0xff]   ;;  %v2941_v10 = vld [vmem:[%s3405_s30 + $0x98] sm:$0xff]   ;;  %v2943_v12 = vld [vmem:[%s3405_s30 + $0x90] sm:$0xff]   ;;  %p3267_p10 = por %p3266_p9, %p3265_p8 }
  0x5d   :  { %v2944_v13 = vld [vmem:[%s3405_s30 + $0x8] sm:$0xff]   ;;  %v2946_v15 = vld [vmem:[%s3405_s30] sm:$0xff]   ;;  %v2948_v17 = vld [vmem:[%s3405_s30 + $0x78] sm:$0xff]  }
  0x5e   :  { %1295 = vmatpush1.bf16.msra.mxu0 %v2934_v3  ;;  %v2945_v14 = vld [vmem:[%s3405_s30 + $0x88] sm:$0xff]   ;;  %v2947_v16 = vld [vmem:[%s3405_s30 + $0x80] sm:$0xff]   ;;  %v2949_v18 = vld [vmem:[%s3405_s30 + $0xf8] sm:$0xff]   ;;  %p3268_p11 = pnand %p3267_p10, %p3261_p6 }
  0x5f   :  { %1584 = vmatpush1.bf16.msra.mxu1 %v2935_v4  ;;  %1296 = vmatprep.subr.bf16.mxu0 %v3299_v0  ;;  %v2950_v20 = vld [vmem:[%s3405_s30 + $0x70] sm:$0xff]   ;;  %v2952_v23 = vld [vmem:[%s3405_s30 + $0x68] sm:$0xff]   ;;  %v2954_v25 = vld [vmem:[%s3405_s30 + $0x60] sm:$0xff]  }
  0x60   :  { %1585 = vmatprep.subr.bf16.mxu1 %v3299_v0  ;;  %v2951_v22 = vld [vmem:[%s3405_s30 + $0xf0] sm:$0xff]   ;;  %v2953_v24 = vld [vmem:[%s3405_s30 + $0xe8] sm:$0xff]   ;;  %v2955_v26 = vld [vmem:[%s3405_s30 + $0xe0] sm:$0xff]  }
  0x61   :  { %v2956_v27 = vld [vmem:[%s3405_s30 + $0x58] sm:$0xff]   ;;  %v2958_v29 = vld [vmem:[%s3405_s30 + $0x50] sm:$0xff]   ;;  %v2960_v31 = vld [vmem:[%s3405_s30 + $0x48] sm:$0xff]  }
  0x62   :  { %1297 = vmatpush1.bf16.msra.mxu0 %v2936_v5  ;;  %v2957_v28 = vld [vmem:[%s3405_s30 + $0xd8] sm:$0xff]   ;;  %v2959_v30 = vld [vmem:[%s3405_s30 + $0xd0] sm:$0xff]   ;;  %v2961_v32 = vld [vmem:[%s3405_s30 + $0xc8] sm:$0xff]  }
  0x63   :  { %1586 = vmatpush1.bf16.msra.mxu1 %v2937_v6  ;;  %1298 = vmatprep.subr.bf16.mxu0 %v3299_v0  ;;  %v2962_v33 = vld [vmem:[%s3405_s30 + $0x40] sm:$0xff]   ;;  %v2975_v40 = vld [vmem:[#allocation7 + $0x28] ss:$16 sps:$4 sm:$0xff]   ;;  %v2978_v42 = vld [vmem:[#allocation7 + $0x4c] ss:$16 sps:$4 sm:$0xff]  }
  0x64   :  { %1587 = vmatprep.subr.bf16.mxu1 %v3299_v0  ;;  %v2963_v34 = vld [vmem:[%s3405_s30 + $0xc0] sm:$0xff]   ;;  %v2981_v44 = vld [vmem:[#allocation7 + $0x48] ss:$16 sps:$4 sm:$0xff]   ;;  %v2984_v46 = vld [vmem:[#allocation7 + $0x6c] ss:$16 sps:$4 sm:$0xff]  }
  0x65   :  { %v2976_v41 = vld [vmem:[#allocation7 + $0x44] ss:$16 sps:$4 sm:$0xff]   ;;  %v2980_v43 = vld [vmem:[#allocation7 + $0x40] ss:$16 sps:$4 sm:$0xff]   ;;  %v2987_v48 = vld [vmem:[#allocation7 + $0x68] ss:$16 sps:$4 sm:$0xff]  }
  0x66   :  { %1299 = vmatpush1.bf16.msra.mxu0 %v2938_v7  ;;  %v2982_v45 = vld [vmem:[#allocation7 + $0x64] ss:$16 sps:$4 sm:$0xff]   ;;  %v2986_v47 = vld [vmem:[#allocation7 + $0x60] ss:$16 sps:$4 sm:$0xff]   ;;  %v2990_v50 = vld [vmem:[#allocation7 + $0x8c] ss:$16 sps:$4 sm:$0xff]  }
  0x67   :  { %1588 = vmatpush1.bf16.msra.mxu1 %v2939_v8  ;;  %1300 = vmatprep.subr.bf16.mxu0 %v3299_v0  ;;  %v2988_v49 = vld [vmem:[#allocation7 + $0x84] ss:$16 sps:$4 sm:$0xff]   ;;  %v2992_v51 = vld [vmem:[#allocation7 + $0x80] ss:$16 sps:$4 sm:$0xff]   ;;  %v2993_v52 = vld [vmem:[#allocation7 + $0x88] ss:$16 sps:$4 sm:$0xff]  }
  0x68   :  { %1589 = vmatprep.subr.bf16.mxu1 %v3299_v0  ;;  %v2994_v53 = vld [vmem:[#allocation7 + $0xa4] ss:$16 sps:$4 sm:$0xff]   ;;  %v2996_v54 = vld [vmem:[#allocation7 + $0xac] ss:$16 sps:$4 sm:$0xff]   ;;  %v2998_v55 = vld [vmem:[#allocation7 + $0xa0] ss:$16 sps:$4 sm:$0xff]  }
  0x69   :  { %v2999_v56 = vld [vmem:[#allocation7 + $0xa8] ss:$16 sps:$4 sm:$0xff]   ;;  %v3000_v57 = vld [vmem:[#allocation7 + $0xc4] ss:$16 sps:$4 sm:$0xff]   ;;  %v3002_v58 = vld [vmem:[#allocation7 + $0xcc] ss:$16 sps:$4 sm:$0xff]  }
  0x6a   :  { %1301 = vmatpush1.bf16.msra.mxu0 %v2940_v9  ;;  %v3004_v59 = vld [vmem:[#allocation7 + $0xc0] ss:$16 sps:$4 sm:$0xff]   ;;  %v3005_v60 = vld [vmem:[#allocation7 + $0xc8] ss:$16 sps:$4 sm:$0xff]   ;;  %v3006_v61 = vld [vmem:[#allocation7 + $0xe4] ss:$16 sps:$4 sm:$0xff]  }
  0x6b   :  { %1590 = vmatpush1.bf16.msra.mxu1 %v2941_v10  ;;  %1302 = vmatprep.subr.bf16.mxu0 %v3299_v0  ;;  %v3008_v62 = vld [vmem:[#allocation7 + $0xec] ss:$16 sps:$4 sm:$0xff]   ;;  %v3010_v63 = vld [vmem:[#allocation7 + $0xe0] ss:$16 sps:$4 sm:$0xff]   ;;  %v3012_v1 = vld [vmem:[#allocation7 + $0x104] ss:$16 sps:$4 sm:$0xff]  }
  0x6c   :  { %1591 = vmatprep.subr.bf16.mxu1 %v3299_v0  ;;  %v3014_v2 = vld [vmem:[#allocation7 + $0x10c] ss:$16 sps:$4 sm:$0xff]   ;;  %v3016_v3 = vld [vmem:[#allocation7 + $0x100] ss:$16 sps:$4 sm:$0xff]   ;;  %v3017_v4 = vld [vmem:[#allocation7 + $0x108] ss:$16 sps:$4 sm:$0xff]  }
  0x6d   :  { %v3018_v5 = vld [vmem:[#allocation7 + $0x124] ss:$16 sps:$4 sm:$0xff]   ;;  %v3020_v6 = vld [vmem:[#allocation7 + $0x12c] ss:$16 sps:$4 sm:$0xff]   ;;  %v3022_v7 = vld [vmem:[#allocation7 + $0x120] ss:$16 sps:$4 sm:$0xff]  }
  0x6e   :  { %1303 = vmatpush1.bf16.msra.mxu0 %v2942_v11  ;;  %v3023_v8 = vld [vmem:[#allocation7 + $0x128] ss:$16 sps:$4 sm:$0xff]   ;;  %v3024_v9 = vld [vmem:[#allocation7 + $0x144] ss:$16 sps:$4 sm:$0xff]   ;;  %v3026_v10 = vld [vmem:[#allocation7 + $0x14c] ss:$16 sps:$4 sm:$0xff]  }
  0x6f   :  { %1592 = vmatpush1.bf16.msra.mxu1 %v2943_v12  ;;  %1304 = vmatprep.subr.bf16.mxu0 %v3299_v0  ;;  %v3028_v11 = vld [vmem:[#allocation7 + $0x140] ss:$16 sps:$4 sm:$0xff]   ;;  %v3029_v12 = vld [vmem:[#allocation7 + $0x148] ss:$16 sps:$4 sm:$0xff]   ;;  %v3042_v21 = vld [vmem:[#allocation7 + $0x1a4] ss:$16 sps:$4 sm:$0xff]  }
  0x70   :  { %1593 = vmatprep.subr.bf16.mxu1 %v3299_v0  ;;  %v3040_v19 = vld [vmem:[#allocation7 + $0x180] ss:$16 sps:$4 sm:$0xff]  }
  0x72   :  { %1305 = vmatpush1.bf16.msra.mxu0 %v2944_v13  ;;  %v3030_v13 = vld [vmem:[#allocation7 + $0x164] ss:$16 sps:$4 sm:$0xff]  }
  0x73   :  { %1594 = vmatpush1.bf16.msra.mxu1 %v2945_v14  ;;  %1306 = vmatprep.subr.bf16.mxu0 %v3299_v0  ;;  %v3032_v14 = vld [vmem:[#allocation7 + $0x16c] ss:$16 sps:$4 sm:$0xff]  }
  0x74   :  { %1595 = vmatprep.subr.bf16.mxu1 %v3299_v0 }
  0x76   :  { %1307 = vmatpush1.bf16.msra.mxu0 %v2946_v15  ;;  %v3034_v15 = vld [vmem:[#allocation7 + $0x160] ss:$16 sps:$4 sm:$0xff]  }
  0x77   :  { %1596 = vmatpush1.bf16.msra.mxu1 %v2947_v16  ;;  %1308 = vmatprep.subr.bf16.mxu0 %v3299_v0  ;;  %v3035_v16 = vld [vmem:[#allocation7 + $0x168] ss:$16 sps:$4 sm:$0xff]  }
  0x78   :  { %1597 = vmatprep.subr.bf16.mxu1 %v3299_v0 }
  0x7a   :  { %1309 = vmatpush2.bf16.msra.mxu0 %v2948_v17  ;;  %v3036_v17 = vld [vmem:[#allocation7 + $0x184] ss:$16 sps:$4 sm:$0xff]  }
  0x7b   :  { %1598 = vmatpush2.bf16.msra.mxu1 %v2949_v18  ;;  %1310 = vmatprep.subr.bf16.mxu0 %v3299_v0  ;;  %v3038_v18 = vld [vmem:[#allocation7 + $0x18c] ss:$16 sps:$4 sm:$0xff]  }
  0x7c   :  { %1599 = vmatprep.subr.bf16.mxu1 %v3299_v0 }
  0x7e   :  { %1311 = vmatpush2.bf16.msra.mxu0 %v2950_v20  ;;  %v3041_v20 = vld [vmem:[#allocation7 + $0x188] ss:$16 sps:$4 sm:$0xff]  }
  0x7f   :  { %1600 = vmatpush2.bf16.msra.mxu1 %v2951_v22  ;;  %1312 = vmatprep.subr.bf16.mxu0 %v3299_v0  ;;  %v3044_v22 = vld [vmem:[#allocation7 + $0x1ac] ss:$16 sps:$4 sm:$0xff]  }
  0x80   :  { %1601 = vmatprep.subr.bf16.mxu1 %v3299_v0 }
  0x82   :  { %1313 = vmatpush2.bf16.msra.mxu0 %v2952_v23  ;;  %v3046_v23 = vld [vmem:[#allocation7 + $0x1a0] ss:$16 sps:$4 sm:$0xff]  }
  0x83   :  { %1602 = vmatpush2.bf16.msra.mxu1 %v2953_v24  ;;  %1314 = vmatprep.subr.bf16.mxu0 %v3299_v0  ;;  %v3047_v24 = vld [vmem:[#allocation7 + $0x1a8] ss:$16 sps:$4 sm:$0xff]  }
  0x84   :  { %1603 = vmatprep.subr.bf16.mxu1 %v3299_v0 }
  0x86   :  { %1315 = vmatpush2.bf16.msra.mxu0 %v2954_v25  ;;  %v3048_v25 = vld [vmem:[#allocation7 + $0x1c4] ss:$16 sps:$4 sm:$0xff]  }
  0x87   :  { %1604 = vmatpush2.bf16.msra.mxu1 %v2955_v26  ;;  %1316 = vmatprep.subr.bf16.mxu0 %v3299_v0  ;;  %v3050_v26 = vld [vmem:[#allocation7 + $0x1cc] ss:$16 sps:$4 sm:$0xff]  }
  0x88   :  { %1605 = vmatprep.subr.bf16.mxu1 %v3299_v0 }
  0x8a   :  { %1317 = vmatpush2.bf16.msra.mxu0 %v2956_v27  ;;  %v3052_v27 = vld [vmem:[#allocation7 + $0x1c0] ss:$16 sps:$4 sm:$0xff]  }
  0x8b   :  { %1606 = vmatpush2.bf16.msra.mxu1 %v2957_v28  ;;  %1318 = vmatprep.subr.bf16.mxu0 %v3299_v0  ;;  %v3053_v28 = vld [vmem:[#allocation7 + $0x1c8] ss:$16 sps:$4 sm:$0xff]  }
  0x8c   :  { %1607 = vmatprep.subr.bf16.mxu1 %v3299_v0 }
  0x8e   :  { %1319 = vmatpush2.bf16.msra.mxu0 %v2958_v29  ;;  %v3054_v29 = vld [vmem:[#allocation7 + $0x1e4] ss:$16 sps:$4 sm:$0xff]  }
  0x8f   :  { %1608 = vmatpush2.bf16.msra.mxu1 %v2959_v30  ;;  %1320 = vmatprep.subr.bf16.mxu0 %v3299_v0  ;;  %v3056_v30 = vld [vmem:[#allocation7 + $0x1ec] ss:$16 sps:$4 sm:$0xff]  }
  0x90   :  { %1609 = vmatprep.subr.bf16.mxu1 %v3299_v0 }
  0x92   :  { %1321 = vmatpush2.bf16.msra.mxu0 %v2960_v31  ;;  %v3058_v31 = vld [vmem:[#allocation7 + $0x1e0] ss:$16 sps:$4 sm:$0xff]  }
  0x93   :  { %1610 = vmatpush2.bf16.msra.mxu1 %v2961_v32  ;;  %1322 = vmatprep.subr.bf16.mxu0 %v3299_v0  ;;  %v3059_v32 = vld [vmem:[#allocation7 + $0x1e8] ss:$16 sps:$4 sm:$0xff]  }
  0x94   :  { %1611 = vmatprep.subr.bf16.mxu1 %v3299_v0  ;;  %v3011_v0 = vld [vmem:[#allocation7 + $0xe8] ss:$16 sps:$4 sm:$0xff]  }
  0x96   :  { %1323 = vmatpush2.bf16.msra.mxu0 %v2962_v33  ;;  %v3060_v33 = vld [vmem:[#allocation7 + $0x204] ss:$16 sps:$4 sm:$0xff]  }
  0x97   :  { %1612 = vmatpush2.bf16.msra.mxu1 %v2963_v34  ;;  %v3062_v34 = vld [vmem:[#allocation7 + $0x20c] ss:$16 sps:$4 sm:$0xff]  }
  0x99   :  { %1325 = vmatmul.mubr.bf16.vlgmr.msra.gmra.mxu0 %v2964_v35  ;;  %v3064_v35 = vld [vmem:[#allocation7 + $0x200] ss:$16 sps:$4 sm:$0xff]  }
  0x9a   :  { %1614 = vmatmul.mubr.bf16.vlgmr.msra.gmra.mxu1 %v2967_v36  ;;  %1332 = vmatprep.mubr.bf16.mxu0 %v2970_v37  ;;  %v3065_v36 = vld [vmem:[#allocation7 + $0x208] ss:$16 sps:$4 sm:$0xff]   ;;  %v3066_v37 = vld [vmem:[#allocation7 + $0x224] ss:$16 sps:$4 sm:$0xff]  }
  0x9b   :  { %1621 = vmatprep.mubr.bf16.mxu1 %v2972_v38  ;;  %v3068_v38 = vld [vmem:[#allocation7 + $0x22c] ss:$16 sps:$4 sm:$0xff]  }
  0xa1   :  { %1333 = vmatmul.mubr.bf16.gmra.mxu0 %v2974_v39  ;;  %v3070_v39 = vld [vmem:[#allocation7 + $0x220] ss:$16 sps:$4 sm:$0xff]  }
  0xa2   :  { %1622 = vmatmul.mubr.bf16.gmra.mxu1 %v2975_v40  ;;  %1340 = vmatprep.mubr.bf16.mxu0 %v2976_v41  ;;  %v3071_v40 = vld [vmem:[#allocation7 + $0x228] ss:$16 sps:$4 sm:$0xff]   ;;  %v3072_v41 = vld [vmem:[#allocation7 + $0x244] ss:$16 sps:$4 sm:$0xff]  }
  0xa3   :  { %1629 = vmatprep.mubr.bf16.mxu1 %v2978_v42  ;;  %v3074_v42 = vld [vmem:[#allocation7 + $0x24c] ss:$16 sps:$4 sm:$0xff]  }
  0xa9   :  { %1341 = vmatmul.mubr.bf16.gmra.mxu0 %v2980_v43  ;;  %v3076_v43 = vld [vmem:[#allocation7 + $0x240] ss:$16 sps:$4 sm:$0xff]  }
  0xaa   :  { %1630 = vmatmul.mubr.bf16.gmra.mxu1 %v2981_v44  ;;  %1348 = vmatprep.mubr.bf16.mxu0 %v2982_v45  ;;  %v3077_v44 = vld [vmem:[#allocation7 + $0x248] ss:$16 sps:$4 sm:$0xff]   ;;  %v3078_v45 = vld [vmem:[#allocation7 + $0x264] ss:$16 sps:$4 sm:$0xff]  }
  0xab   :  { %1637 = vmatprep.mubr.bf16.mxu1 %v2984_v46  ;;  %v3080_v46 = vld [vmem:[#allocation7 + $0x26c] ss:$16 sps:$4 sm:$0xff]  }
  0xb1   :  { %1349 = vmatmul.mubr.bf16.gmra.mxu0 %v2986_v47  ;;  %v3082_v47 = vld [vmem:[#allocation7 + $0x260] ss:$16 sps:$4 sm:$0xff]  }
  0xb2   :  { %1638 = vmatmul.mubr.bf16.gmra.mxu1 %v2987_v48  ;;  %1356 = vmatprep.mubr.bf16.mxu0 %v2988_v49  ;;  %v3083_v48 = vld [vmem:[#allocation7 + $0x268] ss:$16 sps:$4 sm:$0xff]   ;;  %v3084_v49 = vld [vmem:[#allocation7 + $0x284] ss:$16 sps:$4 sm:$0xff]  }
  0xb3   :  { %1645 = vmatprep.mubr.bf16.mxu1 %v2990_v50  ;;  %v3086_v50 = vld [vmem:[#allocation7 + $0x28c] ss:$16 sps:$4 sm:$0xff]  }
  0xb9   :  { %1357 = vmatmul.mubr.bf16.gmra.mxu0 %v2992_v51  ;;  %v3088_v51 = vld [vmem:[#allocation7 + $0x280] ss:$16 sps:$4 sm:$0xff]  }
  0xba   :  { %1646 = vmatmul.mubr.bf16.gmra.mxu1 %v2993_v52  ;;  %1364 = vmatprep.mubr.bf16.mxu0 %v2994_v53  ;;  %v3089_v52 = vld [vmem:[#allocation7 + $0x288] ss:$16 sps:$4 sm:$0xff]   ;;  %v3090_v53 = vld [vmem:[#allocation7 + $0x2a4] ss:$16 sps:$4 sm:$0xff]  }
  0xbb   :  { %1653 = vmatprep.mubr.bf16.mxu1 %v2996_v54  ;;  %v3092_v54 = vld [vmem:[#allocation7 + $0x2ac] ss:$16 sps:$4 sm:$0xff]  }
  0xc1   :  { %1365 = vmatmul.mubr.bf16.gmra.mxu0 %v2998_v55  ;;  %v3094_v55 = vld [vmem:[#allocation7 + $0x2a0] ss:$16 sps:$4 sm:$0xff]  }
  0xc2   :  { %1654 = vmatmul.mubr.bf16.gmra.mxu1 %v2999_v56  ;;  %1372 = vmatprep.mubr.bf16.mxu0 %v3000_v57  ;;  %v3095_v56 = vld [vmem:[#allocation7 + $0x2a8] ss:$16 sps:$4 sm:$0xff]   ;;  %v3096_v57 = vld [vmem:[#allocation7 + $0x2c4] ss:$16 sps:$4 sm:$0xff]  }
  0xc3   :  { %1661 = vmatprep.mubr.bf16.mxu1 %v3002_v58  ;;  %v3098_v58 = vld [vmem:[#allocation7 + $0x2cc] ss:$16 sps:$4 sm:$0xff]  }
  0xc9   :  { %1373 = vmatmul.mubr.bf16.gmra.mxu0 %v3004_v59  ;;  %v3100_v59 = vld [vmem:[#allocation7 + $0x2c0] ss:$16 sps:$4 sm:$0xff]  }
  0xca   :  { %1662 = vmatmul.mubr.bf16.gmra.mxu1 %v3005_v60  ;;  %1380 = vmatprep.mubr.bf16.mxu0 %v3006_v61  ;;  %v3101_v60 = vld [vmem:[#allocation7 + $0x2c8] ss:$16 sps:$4 sm:$0xff]   ;;  %v3102_v61 = vld [vmem:[#allocation7 + $0x2e4] ss:$16 sps:$4 sm:$0xff]  }
  0xcb   :  { %1669 = vmatprep.mubr.bf16.mxu1 %v3008_v62  ;;  %v3104_v62 = vld [vmem:[#allocation7 + $0x2ec] ss:$16 sps:$4 sm:$0xff]  }
  0xd1   :  { %1381 = vmatmul.mubr.bf16.gmra.mxu0 %v3010_v63  ;;  %v3106_v63 = vld [vmem:[#allocation7 + $0x2e0] ss:$16 sps:$4 sm:$0xff]  }
  0xd2   :  { %1670 = vmatmul.mubr.bf16.gmra.mxu1 %v3011_v0  ;;  %1388 = vmatprep.mubr.bf16.mxu0 %v3012_v1  ;;  %v3107_v0 = vld [vmem:[#allocation7 + $0x2e8] ss:$16 sps:$4 sm:$0xff]   ;;  %v3108_v1 = vld [vmem:[#allocation7 + $0x304] ss:$16 sps:$4 sm:$0xff]  }
  0xd3   :  { %1677 = vmatprep.mubr.bf16.mxu1 %v3014_v2  ;;  %v3110_v2 = vld [vmem:[#allocation7 + $0x30c] ss:$16 sps:$4 sm:$0xff]  }
  0xd9   :  { %1389 = vmatmul.mubr.bf16.gmra.mxu0 %v3016_v3  ;;  %v3112_v3 = vld [vmem:[#allocation7 + $0x300] ss:$16 sps:$4 sm:$0xff]  }
  0xda   :  { %1678 = vmatmul.mubr.bf16.gmra.mxu1 %v3017_v4  ;;  %1396 = vmatprep.mubr.bf16.mxu0 %v3018_v5  ;;  %v3113_v4 = vld [vmem:[#allocation7 + $0x308] ss:$16 sps:$4 sm:$0xff]   ;;  %v3114_v5 = vld [vmem:[#allocation7 + $0x324] ss:$16 sps:$4 sm:$0xff]  }
  0xdb   :  { %1685 = vmatprep.mubr.bf16.mxu1 %v3020_v6  ;;  %v3116_v6 = vld [vmem:[#allocation7 + $0x32c] ss:$16 sps:$4 sm:$0xff]  }
  0xe1   :  { %1397 = vmatmul.mubr.bf16.gmra.mxu0 %v3022_v7 }
  0xe2   :  { %1686 = vmatmul.mubr.bf16.gmra.mxu1 %v3023_v8  ;;  %1404 = vmatprep.mubr.bf16.mxu0 %v3024_v9 }
  0xe3   :  { %1693 = vmatprep.mubr.bf16.mxu1 %v3026_v10 }
  0xe9   :  { %1405 = vmatmul.mubr.bf16.gmra.mxu0 %v3028_v11 }
  0xea   :  { %1694 = vmatmul.mubr.bf16.gmra.mxu1 %v3029_v12  ;;  %1412 = vmatprep.mubr.bf16.mxu0 %v3030_v13  ;;  %v3118_v13 = vld [vmem:[#allocation7 + $0x320] ss:$16 sps:$4 sm:$0xff]  }
  0xeb   :  { %1701 = vmatprep.mubr.bf16.mxu1 %v3032_v14 }
  0xf1   :  { %1413 = vmatmul.mubr.bf16.gmra.mxu0 %v3034_v15  ;;  %v3119_v15 = vld [vmem:[#allocation7 + $0x328] ss:$16 sps:$4 sm:$0xff]  }
  0xf2   :  { %1702 = vmatmul.mubr.bf16.gmra.mxu1 %v3035_v16  ;;  %1420 = vmatprep.mubr.bf16.mxu0 %v3036_v17  ;;  %v3120_v16 = vld [vmem:[#allocation7 + $0x344] ss:$16 sps:$4 sm:$0xff]  }
  0xf3   :  { %1709 = vmatprep.mubr.bf16.mxu1 %v3038_v18 }
  0xf9   :  { %1421 = vmatmul.mubr.bf16.gmra.mxu0 %v3040_v19  ;;  %v3122_v19 = vld [vmem:[#allocation7 + $0x34c] ss:$16 sps:$4 sm:$0xff]  }
  0xfa   :  { %1710 = vmatmul.mubr.bf16.gmra.mxu1 %v3041_v20  ;;  %1428 = vmatprep.mubr.bf16.mxu0 %v3042_v21 }
  0xfb   :  { %1717 = vmatprep.mubr.bf16.mxu1 %v3044_v22 }
 0x101   :  { %1429 = vmatmul.mubr.bf16.gmra.mxu0 %v3046_v23 }
 0x102   :  { %1718 = vmatmul.mubr.bf16.gmra.mxu1 %v3047_v24  ;;  %1436 = vmatprep.mubr.bf16.mxu0 %v3048_v25 }
 0x103   :  { %1725 = vmatprep.mubr.bf16.mxu1 %v3050_v26 }
 0x109   :  { %1437 = vmatmul.mubr.bf16.gmra.mxu0 %v3052_v27  ;;  %v3124_v27 = vld [vmem:[#allocation7 + $0x340] ss:$16 sps:$4 sm:$0xff]  }
 0x10a   :  { %1726 = vmatmul.mubr.bf16.gmra.mxu1 %v3053_v28  ;;  %1444 = vmatprep.mubr.bf16.mxu0 %v3054_v29  ;;  %v3125_v29 = vld [vmem:[#allocation7 + $0x348] ss:$16 sps:$4 sm:$0xff]  }
 0x10b   :  { %1733 = vmatprep.mubr.bf16.mxu1 %v3056_v30  ;;  %v3126_v30 = vld [vmem:[#allocation7 + $0x364] ss:$16 sps:$4 sm:$0xff]  }
 0x111   :  { %1445 = vmatmul.mubr.bf16.gmra.mxu0 %v3058_v31 }
 0x112   :  { %1734 = vmatmul.mubr.bf16.gmra.mxu1 %v3059_v32  ;;  %1452 = vmatprep.mubr.bf16.mxu0 %v3060_v33  ;;  %v3128_v33 = vld [vmem:[#allocation7 + $0x36c] ss:$16 sps:$4 sm:$0xff]  }
 0x113   :  { %1741 = vmatprep.mubr.bf16.mxu1 %v3062_v34 }
 0x119   :  { %1453 = vmatmul.mubr.bf16.gmra.mxu0 %v3064_v35 }
 0x11a   :  { %1742 = vmatmul.mubr.bf16.gmra.mxu1 %v3065_v36  ;;  %1460 = vmatprep.mubr.bf16.mxu0 %v3066_v37 }
 0x11b   :  { %1749 = vmatprep.mubr.bf16.mxu1 %v3068_v38 }
 0x121   :  { %1461 = vmatmul.mubr.bf16.gmra.mxu0 %v3070_v39 }
 0x122   :  { %1750 = vmatmul.mubr.bf16.gmra.mxu1 %v3071_v40  ;;  %1468 = vmatprep.mubr.bf16.mxu0 %v3072_v41  ;;  %v3130_v41 = vld [vmem:[#allocation7 + $0x360] ss:$16 sps:$4 sm:$0xff]  }
 0x123   :  { %1757 = vmatprep.mubr.bf16.mxu1 %v3074_v42 }
 0x129   :  { %1469 = vmatmul.mubr.bf16.gmra.mxu0 %v3076_v43  ;;  %v3131_v43 = vld [vmem:[#allocation7 + $0x368] ss:$16 sps:$4 sm:$0xff]  }
 0x12a   :  { %1758 = vmatmul.mubr.bf16.gmra.mxu1 %v3077_v44  ;;  %1476 = vmatprep.mubr.bf16.mxu0 %v3078_v45  ;;  %v3134_v44 = vld [vmem:[#allocation7 + $0x384] ss:$16 sps:$4 sm:$0xff]  }
 0x12b   :  { %1765 = vmatprep.mubr.bf16.mxu1 %v3080_v46 }
 0x131   :  { %1477 = vmatmul.mubr.bf16.gmra.mxu0 %v3082_v47  ;;  %v3137_v47 = vld [vmem:[#allocation7 + $0x38c] ss:$16 sps:$4 sm:$0xff]  }
 0x132   :  { %1766 = vmatmul.mubr.bf16.gmra.mxu1 %v3083_v48  ;;  %1484 = vmatprep.mubr.bf16.mxu0 %v3084_v49 }
 0x133   :  { %1773 = vmatprep.mubr.bf16.mxu1 %v3086_v50 }
 0x139   :  { %1485 = vmatmul.mubr.bf16.gmra.mxu0 %v3088_v51 }
 0x13a   :  { %1774 = vmatmul.mubr.bf16.gmra.mxu1 %v3089_v52  ;;  %1492 = vmatprep.mubr.bf16.mxu0 %v3090_v53 }
 0x13b   :  { %1781 = vmatprep.mubr.bf16.mxu1 %v3092_v54 }
 0x141   :  { %1493 = vmatmul.mubr.bf16.gmra.mxu0 %v3094_v55  ;;  %v3132_v55 = vld [vmem:[#allocation7 + $0x380] ss:$16 sps:$4 sm:$0xff]  }
 0x142   :  { %1782 = vmatmul.mubr.bf16.gmra.mxu1 %v3095_v56  ;;  %1500 = vmatprep.mubr.bf16.mxu0 %v3096_v57  ;;  %v3135_v57 = vld [vmem:[#allocation7 + $0x388] ss:$16 sps:$4 sm:$0xff]  }
 0x143   :  { %1789 = vmatprep.mubr.bf16.mxu1 %v3098_v58  ;;  %v3140_v58 = vld [vmem:[#allocation7 + $0x3a4] ss:$16 sps:$4 sm:$0xff]  }
 0x149   :  { %1501 = vmatmul.mubr.bf16.gmra.mxu0 %v3100_v59 }
 0x14a   :  { %1790 = vmatmul.mubr.bf16.gmra.mxu1 %v3101_v60  ;;  %1508 = vmatprep.mubr.bf16.mxu0 %v3102_v61  ;;  %v3143_v61 = vld [vmem:[#allocation7 + $0x3ac] ss:$16 sps:$4 sm:$0xff]  }
 0x14b   :  { %1797 = vmatprep.mubr.bf16.mxu1 %v3104_v62 }
 0x151   :  { %1509 = vmatmul.mubr.bf16.gmra.mxu0 %v3106_v63 }
 0x152   :  { %1798 = vmatmul.mubr.bf16.gmra.mxu1 %v3107_v0  ;;  %1516 = vmatprep.mubr.bf16.mxu0 %v3108_v1 }
 0x153   :  { %1805 = vmatprep.mubr.bf16.mxu1 %v3110_v2 }
 0x159   :  { %v1326_v7 = vpop.f32.mrf.mxu0  ;;  %1517 = vmatmul.mubr.bf16.gmra.mxu0 %v3112_v3 }
 0x15a   :  { %v1615_v8 = vpop.f32.mrf.mxu1  ;;  %1806 = vmatmul.mubr.bf16.gmra.mxu1 %v3113_v4  ;;  %1524 = vmatprep.mubr.bf16.mxu0 %v3114_v5  ;;  %v3138_v5 = vld [vmem:[#allocation7 + $0x3a0] ss:$16 sps:$4 sm:$0xff]  }
 0x15b   :  { %v3469_v9 = vadd.f32 %v1615_v8, %v1326_v7  ;;  %v1328_v10 = vpop.f32.mrf.mxu0  ;;  %1813 = vmatprep.mubr.bf16.mxu1 %v3116_v6  ;;  %v3141_v7 = vld [vmem:[#allocation7 + $0x3a8] ss:$16 sps:$4 sm:$0xff]   ;;  %v3146_v8 = vld [vmem:[#allocation7 + $0x3c4] ss:$16 sps:$4 sm:$0xff]  }
 0x15c   :  { %v1617_v11 = vpop.f32.mrf.mxu1 }
 0x15d   :  { %v1329_v12 = vpop.f32.mrf.mxu0 }
 0x15e   :  { %v1618_v14 = vpop.f32.mrf.mxu1 }
 0x15f   :  { %v3471_v17 = vadd.f32 %v1618_v14, %v1329_v12  ;;  %v1331_v18 = vpop.f32.mrf.mxu0  ;;  %v3149_v12 = vld [vmem:[#allocation7 + $0x3cc] ss:$16 sps:$4 sm:$0xff]  }
 0x160   :  { %v1620_v20 = vpop.f32.mrf.mxu1 }
 0x161   :  { %v1334_v21 = vpop.f32.mrf.mxu0  ;;  %1525 = vmatmul.mubr.bf16.gmra.mxu0 %v3118_v13 }
 0x162   :  { %v1623_v22 = vpop.f32.mrf.mxu1  ;;  %1814 = vmatmul.mubr.bf16.gmra.mxu1 %v3119_v15  ;;  %1532 = vmatprep.mubr.bf16.mxu0 %v3120_v16 }
 0x163   :  { %v3473_v23 = vadd.f32 %v1623_v22, %v1334_v21  ;;  %v1336_v24 = vpop.f32.mrf.mxu0  ;;  %1821 = vmatprep.mubr.bf16.mxu1 %v3122_v19  ;;  %v3144_v21 = vld [vmem:[#allocation7 + $0x3c0] ss:$16 sps:$4 sm:$0xff]  }
 0x164   :  { %v1625_v25 = vpop.f32.mrf.mxu1  ;;  %v3147_v24 = vld [vmem:[#allocation7 + $0x3c8] ss:$16 sps:$4 sm:$0xff]  }
 0x165   :  { %v1337_v26 = vpop.f32.mrf.mxu0  ;;  %v3152_v25 = vld [vmem:[#allocation7 + $0x3e4] ss:$16 sps:$4 sm:$0xff]  }
 0x166   :  { %v1626_v28 = vpop.f32.mrf.mxu1 }
 0x167   :  { %v3475_v31 = vadd.f32 %v1626_v28, %v1337_v26  ;;  %v1339_v32 = vpop.f32.mrf.mxu0  ;;  %v3155_v28 = vld [vmem:[#allocation7 + $0x3ec] ss:$16 sps:$4 sm:$0xff]  }
 0x168   :  { %v1628_v34 = vpop.f32.mrf.mxu1 }
 0x169   :  { %v1342_v35 = vpop.f32.mrf.mxu0  ;;  %1533 = vmatmul.mubr.bf16.gmra.mxu0 %v3124_v27 }
 0x16a   :  { %v1631_v36 = vpop.f32.mrf.mxu1  ;;  %1822 = vmatmul.mubr.bf16.gmra.mxu1 %v3125_v29  ;;  %1540 = vmatprep.mubr.bf16.mxu0 %v3126_v30 }
 0x16b   :  { %v3477_v37 = vadd.f32 %v1631_v36, %v1342_v35  ;;  %v1344_v38 = vpop.f32.mrf.mxu0  ;;  %1829 = vmatprep.mubr.bf16.mxu1 %v3128_v33 }
 0x16c   :  { %v1633_v39 = vpop.f32.mrf.mxu1  ;;  %v3150_v38 = vld [vmem:[#allocation7 + $0x3e0] ss:$16 sps:$4 sm:$0xff]  }
 0x16d   :  { %v1345_v40 = vpop.f32.mrf.mxu0 }
 0x16e   :  { %v1634_v42 = vpop.f32.mrf.mxu1 }
 0x16f   :  { %v3479_v45 = vadd.f32 %v1634_v42, %v1345_v40  ;;  %v1347_v46 = vpop.f32.mrf.mxu0  ;;  %v3153_v40 = vld [vmem:[#allocation7 + $0x3e8] ss:$16 sps:$4 sm:$0xff]  }
 0x170   :  { %v1636_v48 = vpop.f32.mrf.mxu1 }
 0x171   :  { %v1350_v49 = vpop.f32.mrf.mxu0  ;;  %1541 = vmatmul.mubr.bf16.gmra.mxu0 %v3130_v41 }
 0x172   :  { %v1639_v50 = vpop.f32.mrf.mxu1  ;;  %1830 = vmatmul.mubr.bf16.gmra.mxu1 %v3131_v43  ;;  %1548 = vmatprep.mubr.bf16.mxu0 %v3134_v44 }
 0x173   :  { %v3481_v51 = vadd.f32 %v1639_v50, %v1350_v49  ;;  %v1352_v52 = vpop.f32.mrf.mxu0  ;;  %1837 = vmatprep.mubr.bf16.mxu1 %v3137_v47 }
 0x174   :  { %v1641_v53 = vpop.f32.mrf.mxu1 }
 0x175   :  { %v1353_v54 = vpop.f32.mrf.mxu0 }
 0x176   :  { %v1642_v56 = vpop.f32.mrf.mxu1 }
 0x177   :  { %v3483_v59 = vadd.f32 %v1642_v56, %v1353_v54  ;;  %v1355_v60 = vpop.f32.mrf.mxu0 }
 0x178   :  { %v1644_v62 = vpop.f32.mrf.mxu1 }
 0x179   :  { %v1358_v63 = vpop.f32.mrf.mxu0  ;;  %1549 = vmatmul.mubr.bf16.gmra.mxu0 %v3132_v55 }
 0x17a   :  { %v1647_v0 = vpop.f32.mrf.mxu1  ;;  %1838 = vmatmul.mubr.bf16.gmra.mxu1 %v3135_v57  ;;  %1556 = vmatprep.mubr.bf16.mxu0 %v3140_v58 }
 0x17b   :  { %v3485_v1 = vadd.f32 %v1647_v0, %v1358_v63  ;;  %v1360_v2 = vpop.f32.mrf.mxu0  ;;  %1845 = vmatprep.mubr.bf16.mxu1 %v3143_v61 }
 0x17c   :  { %v1649_v3 = vpop.f32.mrf.mxu1 }
 0x17d   :  { %v1361_v4 = vpop.f32.mrf.mxu0 }
 0x17e   :  { %v1650_v6 = vpop.f32.mrf.mxu1 }
 0x17f   :  { %v3487_v10 = vadd.f32 %v1650_v6, %v1361_v4  ;;  %v1363_v11 = vpop.f32.mrf.mxu0 }
 0x180   :  { %v1652_v13 = vpop.f32.mrf.mxu1 }
 0x181   :  { %v1366_v14 = vpop.f32.mrf.mxu0  ;;  %1557 = vmatmul.mubr.bf16.gmra.mxu0 %v3138_v5 }
 0x182   :  { %v1655_v15 = vpop.f32.mrf.mxu1  ;;  %1846 = vmatmul.mubr.bf16.gmra.mxu1 %v3141_v7  ;;  %1564 = vmatprep.mubr.bf16.mxu0 %v3146_v8 }
 0x183   :  { %v3489_v16 = vadd.f32 %v1655_v15, %v1366_v14  ;;  %v1368_v18 = vpop.f32.mrf.mxu0  ;;  %1853 = vmatprep.mubr.bf16.mxu1 %v3149_v12 }
 0x184   :  { %v1657_v19 = vpop.f32.mrf.mxu1 }
 0x185   :  { %v1369_v20 = vpop.f32.mrf.mxu0 }
 0x186   :  { %v1658_v22 = vpop.f32.mrf.mxu1 }
 0x187   :  { %v3491_v26 = vadd.f32 %v1658_v22, %v1369_v20  ;;  %v1371_v27 = vpop.f32.mrf.mxu0 }
 0x188   :  { %v1660_v29 = vpop.f32.mrf.mxu1 }
 0x189   :  { %v1374_v30 = vpop.f32.mrf.mxu0  ;;  %1565 = vmatmul.mubr.bf16.gmra.mxu0 %v3144_v21 }
 0x18a   :  { %v1663_v32 = vpop.f32.mrf.mxu1  ;;  %1854 = vmatmul.mubr.bf16.gmra.mxu1 %v3147_v24  ;;  %1572 = vmatprep.mubr.bf16.mxu0 %v3152_v25 }
 0x18b   :  { %v3493_v33 = vadd.f32 %v1663_v32, %v1374_v30  ;;  %v1376_v34 = vpop.f32.mrf.mxu0  ;;  %1861 = vmatprep.mubr.bf16.mxu1 %v3155_v28 }
 0x18c   :  { %v1665_v35 = vpop.f32.mrf.mxu1 }
 0x18d   :  { %v1377_v36 = vpop.f32.mrf.mxu0 }
 0x18e   :  { %v1666_v39 = vpop.f32.mrf.mxu1 }
 0x18f   :  { %v3495_v41 = vadd.f32 %v1666_v39, %v1377_v36  ;;  %v1379_v42 = vpop.f32.mrf.mxu0 }
 0x190   :  { %v1668_v43 = vpop.f32.mrf.mxu1 }
 0x191   :  { %v1382_v44 = vpop.f32.mrf.mxu0  ;;  %1573 = vmatmul.mubr.bf16.gmra.mxu0 %v3150_v38 }
 0x192   :  { %v1671_v46 = vpop.f32.mrf.mxu1  ;;  %1862 = vmatmul.mubr.bf16.gmra.mxu1 %v3153_v40 }
 0x193   :  { %v3497_v47 = vadd.f32 %v1671_v46, %v1382_v44  ;;  %v1384_v48 = vpop.f32.mrf.mxu0 }
 0x194   :  { %v1673_v49 = vpop.f32.mrf.mxu1 }
 0x195   :  { %v1385_v50 = vpop.f32.mrf.mxu0 }
 0x196   :  { %v1674_v52 = vpop.f32.mrf.mxu1 }
 0x197   :  { %v3499_v53 = vadd.f32 %v1674_v52, %v1385_v50  ;;  %v1387_v54 = vpop.f32.mrf.mxu0 }
 0x198   :  { %v1676_v55 = vpop.f32.mrf.mxu1 }
 0x199   :  { %v1390_v56 = vpop.f32.mrf.mxu0 }
 0x19a   :  { %v1679_v57 = vpop.f32.mrf.mxu1 }
 0x19b   :  { %v3501_v58 = vadd.f32 %v1679_v57, %v1390_v56  ;;  %v1392_v60 = vpop.f32.mrf.mxu0 }
 0x19c   :  { %v1681_v61 = vpop.f32.mrf.mxu1 }
 0x19d   :  { %v1393_v62 = vpop.f32.mrf.mxu0 }
 0x19e   :  { %v1682_v63 = vpop.f32.mrf.mxu1 }
 0x19f   :  { %v3503_v0 = vadd.f32 %v1682_v63, %v1393_v62  ;;  %v1395_v2 = vpop.f32.mrf.mxu0 }
 0x1a0   :  { %v1684_v3 = vpop.f32.mrf.mxu1 }
 0x1a1   :  { %v1398_v4 = vpop.f32.mrf.mxu0 }
 0x1a2   :  { %v1687_v5 = vpop.f32.mrf.mxu1 }
 0x1a3   :  { %v3505_v6 = vadd.f32 %v1687_v5, %v1398_v4  ;;  %v1400_v7 = vpop.f32.mrf.mxu0 }
 0x1a4   :  { %v1689_v8 = vpop.f32.mrf.mxu1 }
 0x1a5   :  { %v1401_v11 = vpop.f32.mrf.mxu0 }
 0x1a6   :  { %v1690_v12 = vpop.f32.mrf.mxu1 }
 0x1a7   :  { %v3507_v13 = vadd.f32 %v1690_v12, %v1401_v11  ;;  %v1403_v14 = vpop.f32.mrf.mxu0 }
 0x1a8   :  { %v1692_v15 = vpop.f32.mrf.mxu1 }
 0x1a9   :  { %v1406_v18 = vpop.f32.mrf.mxu0 }
 0x1aa   :  { %v1695_v19 = vpop.f32.mrf.mxu1 }
 0x1ab   :  { %v3509_v20 = vadd.f32 %v1695_v19, %v1406_v18  ;;  %v1408_v21 = vpop.f32.mrf.mxu0 }
 0x1ac   :  { %v1697_v22 = vpop.f32.mrf.mxu1 }
 0x1ad   :  { %v3511_v24 = vpop.f32.mrf.mxu0 }
 0x1ae   :  { %v3513_v25 = vpop.f32.mrf.mxu1 }
 0x1af   :  { %v1411_v27 = vpop.f32.mrf.mxu0 }
 0x1b0   :  { %v1700_v28 = vpop.f32.mrf.mxu1  ;;  %v3530_v27 = vld [vmem:[%s3754_s5] ss:$0 sm:$0xff] }
 0x1b1   :  { %v3515_v29 = vpop.f32.mrf.mxu0 }
 0x1b2   :  { %v3517_v30 = vpop.f32.mrf.mxu1 }
 0x1b3   :  { %v1416_v32 = vpop.f32.mrf.mxu0 }
 0x1b4   :  { %v1705_v34 = vpop.f32.mrf.mxu1 }
 0x1b5   :  { %v3519_v35 = vpop.f32.mrf.mxu0 }
 0x1b6   :  { %v3521_v36 = vpop.f32.mrf.mxu1 }
 0x1b7   :  { %v1419_v38 = vpop.f32.mrf.mxu0 }
 0x1b8   :  { %v1708_v39 = vpop.f32.mrf.mxu1  ;;  %v2093_v38 = vadd.f32 %v3530_v27, %v3499_v53  ;;  %v2091_v53 = vadd.f32 %v3530_v27, %v3495_v41 }
 0x1b9   :  { %v3523_v40 = vpop.f32.mrf.mxu0 }
 0x1ba   :  { %v3525_v42 = vpop.f32.mrf.mxu1 }
 0x1bb   :  { %v1424_v43 = vpop.f32.mrf.mxu0 }
 0x1bc   :  { %v1713_v44 = vpop.f32.mrf.mxu1 }
 0x1bd   :  { %v1425_v46 = vpop.f32.mrf.mxu0 }
 0x1be   :  { %v1714_v48 = vpop.f32.mrf.mxu1 }
 0x1bf   :  { %v1427_v49 = vpop.f32.mrf.mxu0 }
 0x1c0   :  { %v1716_v50 = vpop.f32.mrf.mxu1 }
 0x1c1   :  { %v1430_v52 = vpop.f32.mrf.mxu0 }
 0x1c2   :  { %v1719_v54 = vpop.f32.mrf.mxu1 }
 0x1c3   :  { %v1432_v55 = vpop.f32.mrf.mxu0 }
 0x1c4   :  { %v1721_v56 = vpop.f32.mrf.mxu1  ;;  %v2092_v55 = vadd.f32 %v3530_v27, %v3497_v47  ;;  %v2090_v47 = vadd.f32 %v3530_v27, %v3493_v33  ;;  %v1712_v33 = vadd.f32 %v3525_v42, %v3523_v40  ;;  %v2087_v42 = vadd.f32 %v3530_v27, %v3487_v10 }
 0x1c5   :  { %v1433_v57 = vpop.f32.mrf.mxu0  ;;  %v1699_v10 = vadd.f32 %v3513_v25, %v3511_v24  ;;  %v2084_v24 = vadd.f32 %v3530_v27, %v3481_v51 }
 0x1c6   :  { %v1722_v60 = vpop.f32.mrf.mxu1 }
 0x1c7   :  { %v1435_v61 = vpop.f32.mrf.mxu0 }
 0x1c8   :  { %v1724_v62 = vpop.f32.mrf.mxu1  ;;  %v1723_v61 = vadd.f32 %v1722_v60, %v1433_v57  ;;  %v2156_v57 = vmax.f32 %v2092_v55, 0.0 }
 0x1c9   :  { %v1438_v63 = vpop.f32.mrf.mxu0 }
 0x1ca   :  { %v1727_v2 = vpop.f32.mrf.mxu1 }
 0x1cb   :  { %v1440_v3 = vpop.f32.mrf.mxu0  ;;  %v1728_v43 = vadd.f32 %v1727_v2, %v1438_v63  ;;  %v2157_v63 = vmax.f32 %v2093_v38, 0.0 }
 0x1cc   :  { %v1729_v4 = vpop.f32.mrf.mxu1 }
 0x1cd   :  { %v1441_v5 = vpop.f32.mrf.mxu0 }
 0x1ce   :  { %v1730_v7 = vpop.f32.mrf.mxu1 }
 0x1cf   :  { %v1443_v8 = vpop.f32.mrf.mxu0  ;;  %v1731_v28 = vadd.f32 %v1730_v7, %v1441_v5  ;;  %v1720_v7 = vadd.f32 %v1719_v54, %v1430_v52  ;;  %v2089_v52 = vadd.f32 %v3530_v27, %v3491_v26  ;;  %v2155_v54 = vmax.f32 %v2091_v53, 0.0 }
 0x1d0   :  { %v1732_v11 = vpop.f32.mrf.mxu1  ;;  %v2106_v8 = vadd.f32 %v3530_v27, %v1728_v43  ;;  %v1707_v26 = vadd.f32 %v3521_v36, %v3519_v35  ;;  %v2086_v36 = vadd.f32 %v3530_v27, %v3485_v1  ;;  %v2151_v53 = vmax.f32 %v2087_v42, 0.0 }
 0x1d1   :  { %v1446_v12 = vpop.f32.mrf.mxu0  ;;  %v2107_v62 = vadd.f32 %v3530_v27, %v1731_v28 }
 0x1d2   :  { %v1735_v14 = vpop.f32.mrf.mxu1  ;;  %v2170_v28 = vmax.f32 %v2106_v8, 0.0  ;;  %v2150_v25 = vmax.f32 %v2086_v36, 0.0 }
 0x1d3   :  { %v1448_v15 = vpop.f32.mrf.mxu0  ;;  %v1736_v19 = vadd.f32 %v1735_v14, %v1446_v12  ;;  %v1715_v14 = vadd.f32 %v1714_v48, %v1425_v46  ;;  %v2088_v48 = vadd.f32 %v3530_v27, %v3489_v16  ;;  %v1704_v16 = vadd.f32 %v3517_v30, %v3515_v29 }
 0x1d4   :  { %v1737_v18 = vpop.f32.mrf.mxu1  ;;  %v2105_v15 = vadd.f32 %v3530_v27, %v1723_v61  ;;  %v2085_v30 = vadd.f32 %v3530_v27, %v3483_v59 }
 0x1d5   :  { %v1449_v21 = vpop.f32.mrf.mxu0  ;;  %v2108_v44 = vadd.f32 %v3530_v27, %v1736_v19  ;;  %v2171_v18 = vmax.f32 %v2107_v62, 0.0  ;;  %v2103_v38 = vadd.f32 %v3530_v27, %v1715_v14  ;;  %v2101_v62 = vadd.f32 %v3530_v27, %v1707_v26 }
 0x1d6   :  { %v1738_v22 = vpop.f32.mrf.mxu1  ;;  %v2100_v1 = vadd.f32 %v3530_v27, %v1704_v16 }
 0x1d7   :  { %v1739_v32 = vadd.f32 %v1738_v22, %v1449_v21  ;;  %v1451_v34 = vpop.f32.mrf.mxu0  ;;  %v2172_v11 = vmax.f32 %v2108_v44, 0.0  ;;  %v2104_v22 = vadd.f32 %v3530_v27, %v1720_v7  ;;  %v2153_v44 = vmax.f32 %v2089_v52, 0.0 }
 0x1d8   :  { %v1740_v39 = vpop.f32.mrf.mxu1  ;;  %v2164_v51 = vmax.f32 %v2100_v1, 0.0  ;;  %v2148_v52 = vmax.f32 %v2084_v24, 0.0 }
 0x1d9   :  { %v2109_v49 = vadd.f32 %v3530_v27, %v1739_v32  ;;  %v1454_v50 = vpop.f32.mrf.mxu0  ;;  %v2154_v32 = vmax.f32 %v2090_v47, 0.0  ;;  %v2169_v39 = vmax.f32 %v2105_v15, 0.0  ;;  %v2168_v55 = vmax.f32 %v2104_v22, 0.0 }
 0x1da   :  { %v1743_v56 = vpop.f32.mrf.mxu1  ;;  %v2098_v15 = vadd.f32 %v3530_v27, %v3509_v20  ;;  %v2081_v20 = vadd.f32 %v3530_v27, %v3475_v31 }
 0x1db   :  { %v2173_v3 = vmax.f32 %v2109_v49, 0.0  ;;  %v3539_v4 = vadd.f32 %v1743_v56, %v1454_v50  ;;  %v1456_v5 = vpop.f32.mrf.mxu0  ;;  %v2102_v50 = vadd.f32 %v3530_v27, %v1712_v33  ;;  %v2152_v56 = vmax.f32 %v2088_v48, 0.0 }
 0x1dc   :  { %v1745_v2 = vpop.f32.mrf.mxu1  ;;  %v2162_v48 = vmax.f32 %v2098_v15, 0.0  ;;  %v2145_v42 = vmax.f32 %v2081_v20, 0.0  ;;  %v2369_v15 = vld [vmem:[#allocation13 + $0x60] sm:$0xff] }
 0x1dd   :  { %2743 = vmatprep.subr.mxu0 %v2173_v3  ;;  %v1457_v12 = vpop.f32.mrf.mxu0  ;;  %v2167_v3 = vmax.f32 %v2103_v38, 0.0  ;;  %v2166_v2 = vmax.f32 %v2102_v50, 0.0  ;;  %v2095_v38 = vadd.f32 %v3530_v27, %v3503_v0  ;;  %v2078_v0 = vadd.f32 %v3530_v27, %v3469_v9  ;;  %v2207_v9 = vld [vmem:[#allocation12] sm:$0xff] }
 0x1de   :  { %v1746_v60 = vpop.f32.mrf.mxu1  ;;  %2744 = vmatpush3.msra.mxu0 %v2157_v63 }
 0x1df   :  { %v3547_v19 = vadd.f32 %v1746_v60, %v1457_v12  ;;  %2745 = vmatprep.subr.mxu0 %v2172_v11  ;;  %v1459_v41 = vpop.f32.mrf.mxu0  ;;  %v2099_v11 = vadd.f32 %v3530_v27, %v1699_v10  ;;  %v2165_v12 = vmax.f32 %v2101_v62, 0.0  ;;  %v2149_v60 = vmax.f32 %v2085_v30, 0.0  ;;  %v2208_v62 = vld [vmem:[#allocation12 + $0x8] sm:$0xff] }
 0x1e0   :  { %v1748_v21 = vpop.f32.mrf.mxu1  ;;  %2746 = vmatpush3.msra.mxu0 %v2156_v57  ;;  %v2083_v57 = vadd.f32 %v3530_v27, %v3479_v45  ;;  %v2082_v41 = vadd.f32 %v3530_v27, %v3477_v37  ;;  %v2096_v37 = vadd.f32 %v3530_v27, %v3505_v6  ;;  %v2079_v6 = vadd.f32 %v3530_v27, %v3471_v17 }
 0x1e1   :  { %2747 = vmatprep.subr.mxu0 %v2171_v18  ;;  %v1462_v46 = vpop.f32.mrf.mxu0  ;;  %v2097_v21 = vadd.f32 %v3530_v27, %v3507_v13  ;;  %v2163_v33 = vmax.f32 %v2099_v11, 0.0  ;;  %v2080_v13 = vadd.f32 %v3530_v27, %v3473_v23  ;;  %v2094_v23 = vadd.f32 %v3530_v27, %v3501_v58  ;;  %2275 = vmatprep.mubr.f32.mxu0 %v2208_v62 }
 0x1e2   :  { %v1751_v34 = vpop.f32.mrf.mxu1  ;;  %2748 = vmatpush3.msra.mxu0 %v2155_v54 }
 0x1e3   :  { %v3559_v43 = vadd.f32 %v1751_v34, %v1462_v46  ;;  %2749 = vmatprep.subr.mxu0 %v2170_v28  ;;  %v1464_v40 = vpop.f32.mrf.mxu0  ;;  %v2147_v28 = vmax.f32 %v2083_v57, 0.0  ;;  %v2146_v34 = vmax.f32 %v2082_v41, 0.0  ;;  %v2144_v50 = vmax.f32 %v2080_v13, 0.0  ;;  %v2370_v57 = vld [vmem:[#allocation13 + $0x68] sm:$0xff] }
 0x1e4   :  { %v1753_v49 = vpop.f32.mrf.mxu1  ;;  %2750 = vmatpush3.msra.mxu0 %v2154_v32  ;;  %v2158_v10 = vmax.f32 %v2094_v23, 0.0 }
 0x1e5   :  { %2751 = vmatprep.subr.mxu0 %v2169_v39  ;;  %v1465_v35 = vpop.f32.mrf.mxu0  ;;  %v2161_v39 = vmax.f32 %v2097_v21, 0.0  ;;  %v2160_v49 = vmax.f32 %v2096_v37, 0.0 }
 0x1e6   :  { %v1754_v61 = vpop.f32.mrf.mxu1  ;;  %2752 = vmatpush3.msra.mxu0 %v2153_v44 }
 0x1e7   :  { %v3571_v5 = vadd.f32 %v1754_v61, %v1465_v35  ;;  %2753 = vmatprep.subr.mxu0 %v2168_v55  ;;  %v1467_v29 = vpop.f32.mrf.mxu0  ;;  %v2159_v35 = vmax.f32 %v2095_v38, 0.0  ;;  %v2364_v38 = vld [vmem:[#allocation13 + $0x38] sm:$0xff] }
 0x1e8   :  { %v1756_v63 = vpop.f32.mrf.mxu1  ;;  %2754 = vmatpush3.msra.mxu0 %v2152_v56  ;;  %v2143_v56 = vmax.f32 %v2079_v6, 0.0  ;;  %v2363_v6 = vld [vmem:[#allocation13 + $0x30] sm:$0xff] }
 0x1e9   :  { %2755 = vmatprep.subr.mxu0 %v2167_v3  ;;  %v1470_v7 = vpop.f32.mrf.mxu0  ;;  %v2142_v3 = vmax.f32 %v2078_v0, 0.0  ;;  %v2210_v63 = vld [vmem:[#allocation12 + $0x18] sm:$0xff] }
 0x1ea   :  { %v1759_v8 = vpop.f32.mrf.mxu1  ;;  %2756 = vmatpush3.msra.mxu0 %v2151_v53  ;;  %2345 = vmatprep.mubr.f32.mxu1 %v2210_v63 }
 0x1eb   :  { %v3579_v47 = vadd.f32 %v1759_v8, %v1470_v7  ;;  %2757 = vmatprep.subr.mxu0 %v2166_v2  ;;  %v1472_v59 = vpop.f32.mrf.mxu0  ;;  %v2372_v7 = vld [vmem:[#allocation13 + $0x78] sm:$0xff]  ;;  %v2371_v8 = vld [vmem:[#allocation13 + $0x70] sm:$0xff] }
 0x1ec   :  { %v1761_v14 = vpop.f32.mrf.mxu1  ;;  %2758 = vmatpush3.msra.mxu0 %v2150_v25  ;;  %v3300_v25 = vmov 0.0  }
 0x1ed   :  { %2759 = vmatprep.subr.mxu0 %v2165_v12  ;;  %v1473_v18 = vpop.f32.mrf.mxu0 }
 0x1ee   :  { %v1762_v54 = vpop.f32.mrf.mxu1  ;;  %2760 = vmatpush3.msra.mxu0 %v2149_v60 }
 0x1ef   :  { %v3589_v45 = vadd.f32 %v1762_v54, %v1473_v18  ;;  %2761 = vmatprep.subr.mxu0 %v2164_v51  ;;  %v1475_v22 = vpop.f32.mrf.mxu0 }
 0x1f0   :  { %v1764_v46 = vpop.f32.mrf.mxu1  ;;  %2762 = vmatpush3.msra.mxu0 %v2148_v52  ;;  %v2368_v52 = vld [vmem:[#allocation13 + $0x58] sm:$0xff] }
 0x1f1   :  { %2763 = vmatprep.subr.mxu0 %v2163_v33  ;;  %v1478_v32 = vpop.f32.mrf.mxu0  ;;  %v2367_v33 = vld [vmem:[#allocation13 + $0x50] sm:$0xff]  ;;  %v2366_v46 = vld [vmem:[#allocation13 + $0x48] sm:$0xff] }
 0x1f2   :  { %v1767_v26 = vpop.f32.mrf.mxu1  ;;  %2764 = vmatpush3.msra.mxu0 %v2147_v28 }
 0x1f3   :  { %v3599_v31 = vadd.f32 %v1767_v26, %v1478_v32  ;;  %2765 = vmatprep.subr.mxu0 %v2162_v48  ;;  %v1480_v40 = vpop.f32.mrf.mxu0  ;;  %v2365_v32 = vld [vmem:[#allocation13 + $0x40] sm:$0xff] }
 0x1f4   :  { %v1769_v44 = vpop.f32.mrf.mxu1  ;;  %2766 = vmatpush3.msra.mxu0 %v2146_v34 }
 0x1f5   :  { %2767 = vmatprep.subr.mxu0 %v2161_v39  ;;  %v1481_v16 = vpop.f32.mrf.mxu0 }
 0x1f6   :  { %v1770_v55 = vpop.f32.mrf.mxu1  ;;  %2768 = vmatpush3.msra.mxu0 %v2145_v42 }
 0x1f7   :  { %v3607_v36 = vadd.f32 %v1770_v55, %v1481_v16  ;;  %2769 = vmatprep.subr.mxu0 %v2160_v49  ;;  %v1483_v17 = vpop.f32.mrf.mxu0  ;;  %v2362_v49 = vld [vmem:[#allocation13 + $0x28] sm:$0xff] }
 0x1f8   :  { %v1772_v61 = vpop.f32.mrf.mxu1  ;;  %2770 = vmatpush3.msra.mxu0 %v2144_v50  ;;  %v2361_v50 = vld [vmem:[#allocation13 + $0x20] sm:$0xff] }
 0x1f9   :  { %2771 = vmatprep.subr.mxu0 %v2159_v35  ;;  %v1486_v58 = vpop.f32.mrf.mxu0 }
 0x1fa   :  { %v1775_v29 = vpop.f32.mrf.mxu1  ;;  %2772 = vmatpush3.msra.mxu0 %v2143_v56 }
 0x1fb   :  { %v3609_v30 = vadd.f32 %v1775_v29, %v1486_v58  ;;  %2773 = vmatprep.subr.mxu0 %v2158_v10  ;;  %v1488_v53 = vpop.f32.mrf.mxu0 }
 0x1fc   :  { %v1777_v1 = vpop.f32.mrf.mxu1  ;;  %2774 = vmatpush3.msra.mxu0 %v2142_v3 }
 0x1fd   :  { %v1489_v2 = vpop.f32.mrf.mxu0  ;;  %2276 = vmatmul.mubr.f32.vlgmr.msra.gmra.mxu0 %v2207_v9  ;;  %2847 = vmatprep.subr.mxu0 %v3300_v25 }
 0x1fe   :  { %v1778_v24 = vpop.f32.mrf.mxu1  ;;  %2848 = vmatpush3.msra.mxu0 %v2372_v7  ;;  %2879 = vmatprep.mubr.msk.f32.mxu0 %vm3301_vm0, %v3300_v25 }
 0x1ff   :  { %v3612_v11 = vadd.f32 %v1778_v24, %v1489_v2  ;;  %v1491_v12 = vpop.f32.mrf.mxu0  ;;  %2849 = vmatprep.subr.mxu0 %v3300_v25 }
 0x200   :  { %v1780_v59 = vpop.f32.mrf.mxu1  ;;  %2850 = vmatpush3.msra.mxu0 %v2371_v8 }
 0x201   :  { %v1494_v60 = vpop.f32.mrf.mxu0  ;;  %2851 = vmatprep.subr.mxu0 %v3300_v25 }
 0x202   :  { %v1783_v14 = vpop.f32.mrf.mxu1  ;;  %2852 = vmatpush3.msra.mxu0 %v2370_v57 }
 0x203   :  { %v3616_v51 = vadd.f32 %v1783_v14, %v1494_v60  ;;  %v1496_v18 = vpop.f32.mrf.mxu0  ;;  %2853 = vmatprep.subr.mxu0 %v3300_v25 }
 0x204   :  { %v1785_v41 = vpop.f32.mrf.mxu1  ;;  %2854 = vmatpush3.msra.mxu0 %v2369_v15 }
 0x205   :  { %v1497_v54 = vpop.f32.mrf.mxu0  ;;  %2855 = vmatprep.subr.mxu0 %v3300_v25 }
 0x206   :  { %v1786_v21 = vpop.f32.mrf.mxu1  ;;  %2856 = vmatpush3.msra.mxu0 %v2368_v52 }
 0x207   :  { %v3620_v22 = vadd.f32 %v1786_v21, %v1497_v54  ;;  %v1499_v20 = vpop.f32.mrf.mxu0  ;;  %2857 = vmatprep.subr.mxu0 %v3300_v25 }
 0x208   :  { %v1788_v28 = vpop.f32.mrf.mxu1  ;;  %2858 = vmatpush3.msra.mxu0 %v2367_v33 }
 0x209   :  { %v1502_v37 = vpop.f32.mrf.mxu0  ;;  %2859 = vmatprep.subr.mxu0 %v3300_v25 }
 0x20a   :  { %v1791_v48 = vpop.f32.mrf.mxu1  ;;  %2860 = vmatpush3.msra.mxu0 %v2366_v46 }
 0x20b   :  { %v3624_v13 = vadd.f32 %v1791_v48, %v1502_v37  ;;  %v1504_v34 = vpop.f32.mrf.mxu0  ;;  %2861 = vmatprep.subr.mxu0 %v3300_v25 }
 0x20c   :  { %v1793_v26 = vpop.f32.mrf.mxu1  ;;  %2862 = vmatpush3.msra.mxu0 %v2365_v32 }
 0x20d   :  { %v1505_v39 = vpop.f32.mrf.mxu0  ;;  %2863 = vmatprep.subr.mxu0 %v3300_v25 }
 0x20e   :  { %v1794_v40 = vpop.f32.mrf.mxu1  ;;  %2864 = vmatpush3.msra.mxu0 %v2364_v38 }
 0x20f   :  { %v3628_v42 = vadd.f32 %v1794_v40, %v1505_v39  ;;  %v1507_v44 = vpop.f32.mrf.mxu0  ;;  %2865 = vmatprep.subr.mxu0 %v3300_v25 }
 0x210   :  { %v1796_v23 = vpop.f32.mrf.mxu1  ;;  %2866 = vmatpush3.msra.mxu0 %v2363_v6 }
 0x211   :  { %v1510_v16 = vpop.f32.mrf.mxu0  ;;  %2867 = vmatprep.subr.mxu0 %v3300_v25 }
 0x212   :  { %v1799_v0 = vpop.f32.mrf.mxu1  ;;  %2868 = vmatpush3.msra.mxu0 %v2362_v49 }
 0x213   :  { %v3632_v55 = vadd.f32 %v1799_v0, %v1510_v16  ;;  %v1512_v35 = vpop.f32.mrf.mxu0  ;;  %2869 = vmatprep.subr.mxu0 %v3300_v25 }
 0x214   :  { %v1801_v17 = vpop.f32.mrf.mxu1  ;;  %2870 = vmatpush3.msra.mxu0 %v2361_v50 }
 0x215   :  { %v1513_v56 = vpop.f32.mrf.mxu0  ;;  %2871 = vmatprep.subr.mxu0 %v3300_v25 }
 0x216   :  { %v1802_v61 = vpop.f32.mrf.mxu1 }
 0x217   :  { %v3636_v10 = vadd.f32 %v1802_v61, %v1513_v56  ;;  %v1515_v58 = vpop.f32.mrf.mxu0 }
 0x218   :  { %v1804_v62 = vpop.f32.mrf.mxu1 }
 0x219   :  { %v1518_v3 = vpop.f32.mrf.mxu0 }
 0x21a   :  { %v1807_v29 = vpop.f32.mrf.mxu1 }
 0x21b   :  { %v3638_v9 = vadd.f32 %v1807_v29, %v1518_v3  ;;  %v1520_v53 = vpop.f32.mrf.mxu0 }
 0x21c   :  { %v1809_v63 = vpop.f32.mrf.mxu1 }
 0x21d   :  { %v1521_v1 = vpop.f32.mrf.mxu0 }
 0x21e   :  { %v1810_v2 = vpop.f32.mrf.mxu1 }
 0x21f   :  { %v3640_v7 = vadd.f32 %v1810_v2, %v1521_v1  ;;  %v1523_v24 = vpop.f32.mrf.mxu0 }
 0x220   :  { %v1812_v8 = vpop.f32.mrf.mxu1 }
 0x221   :  { %v1526_v12 = vpop.f32.mrf.mxu0 }
 0x222   :  { %v1815_v59 = vpop.f32.mrf.mxu1 }
 0x223   :  { %v3642_v57 = vadd.f32 %v1815_v59, %v1526_v12  ;;  %v1528_v60 = vpop.f32.mrf.mxu0 }
 0x224   :  { %v1817_v14 = vpop.f32.mrf.mxu1 }
 0x225   :  { %v1529_v15 = vpop.f32.mrf.mxu0 }
 0x226   :  { %v1818_v18 = vpop.f32.mrf.mxu1 }
 0x227   :  { %v3644_v41 = vadd.f32 %v1818_v18, %v1529_v15  ;;  %v1531_v52 = vpop.f32.mrf.mxu0 }
 0x228   :  { %v1820_v54 = vpop.f32.mrf.mxu1 }
 0x229   :  { %v1534_v21 = vpop.f32.mrf.mxu0 }
 0x22a   :  { %v1823_v33 = vpop.f32.mrf.mxu1 }
 0x22b   :  { %v3646_v20 = vadd.f32 %v1823_v33, %v1534_v21  ;;  %v1536_v28 = vpop.f32.mrf.mxu0 }
 0x22c   :  { %v1825_v46 = vpop.f32.mrf.mxu1 }
 0x22d   :  { %v3648_v37 = vpop.f32.mrf.mxu0 }
 0x22e   :  { %v3650_v48 = vpop.f32.mrf.mxu1 }
 0x22f   :  { %v1539_v32 = vpop.f32.mrf.mxu0 }
 0x230   :  { %v1828_v34 = vpop.f32.mrf.mxu1 }
 0x231   :  { %v3652_v26 = vpop.f32.mrf.mxu0 }
 0x232   :  { %v3654_v38 = vpop.f32.mrf.mxu1 }
 0x233   :  { %v1544_v39 = vpop.f32.mrf.mxu0 }
 0x234   :  { %v1833_v40 = vpop.f32.mrf.mxu1 }
 0x235   :  { %v3656_v6 = vpop.f32.mrf.mxu0 }
 0x236   :  { %v3658_v44 = vpop.f32.mrf.mxu1 }
 0x237   :  { %v1547_v23 = vpop.f32.mrf.mxu0 }
 0x238   :  { %v1836_v49 = vpop.f32.mrf.mxu1 }
 0x239   :  { %v1550_v16 = vpop.f32.mrf.mxu0  ;;  %v2125_v49 = vadd.f32 %v3530_v27, %v3636_v10 }
 0x23a   :  { %v1839_v0 = vpop.f32.mrf.mxu1 }
 0x23b   :  { %v1552_v50 = vpop.f32.mrf.mxu0 }
 0x23c   :  { %v1841_v35 = vpop.f32.mrf.mxu1 }
 0x23d   :  { %v1553_v17 = vpop.f32.mrf.mxu0 }
 0x23e   :  { %v1842_v56 = vpop.f32.mrf.mxu1 }
 0x23f   :  { %v1555_v61 = vpop.f32.mrf.mxu0 }
 0x240   :  { %v1844_v58 = vpop.f32.mrf.mxu1 }
 0x241   :  { %v1558_v62 = vpop.f32.mrf.mxu0 }
 0x242   :  { %v1847_v3 = vpop.f32.mrf.mxu1 }
 0x243   :  { %v1560_v29 = vpop.f32.mrf.mxu0 }
 0x244   :  { %v1849_v53 = vpop.f32.mrf.mxu1  ;;  %v2124_v29 = vadd.f32 %v3530_v27, %v3632_v55 }
 0x245   :  { %v1561_v63 = vpop.f32.mrf.mxu0 }
 0x246   :  { %v1850_v1 = vpop.f32.mrf.mxu1 }
 0x247   :  { %v1563_v2 = vpop.f32.mrf.mxu0  ;;  %v1851_v53 = vadd.f32 %v1850_v1, %v1561_v63  ;;  %v2121_v1 = vadd.f32 %v3530_v27, %v3620_v22  ;;  %v2119_v22 = vadd.f32 %v3530_v27, %v3612_v11 }
 0x248   :  { %v1852_v24 = vpop.f32.mrf.mxu1 }
 0x249   :  { %v1566_v8 = vpop.f32.mrf.mxu0  ;;  %v2137_v55 = vadd.f32 %v3530_v27, %v1851_v53 }
 0x24a   :  { %v1855_v12 = vpop.f32.mrf.mxu1 }
 0x24b   :  { %v1568_v59 = vpop.f32.mrf.mxu0  ;;  %v1856_v35 = vadd.f32 %v1855_v12, %v1566_v8  ;;  %v2122_v8 = vadd.f32 %v3530_v27, %v3624_v13  ;;  %v2188_v12 = vmax.f32 %v2124_v29, 0.0  ;;  %v2120_v13 = vadd.f32 %v3530_v27, %v3616_v51 }
 0x24c   :  { %v1857_v60 = vpop.f32.mrf.mxu1  ;;  %v2123_v59 = vadd.f32 %v3530_v27, %v3628_v42 }
 0x24d   :  { %v1569_v14 = vpop.f32.mrf.mxu0  ;;  %v2189_v60 = vmax.f32 %v2125_v49, 0.0  ;;  %v2138_v10 = vadd.f32 %v3530_v27, %v1856_v35  ;;  %v2129_v35 = vadd.f32 %v3530_v27, %v3644_v41  ;;  %v2127_v41 = vadd.f32 %v3530_v27, %v3640_v7 }
 0x24e   :  { %v1858_v15 = vpop.f32.mrf.mxu1  ;;  %v2187_v42 = vmax.f32 %v2123_v59, 0.0 }
 0x24f   :  { %v1571_v18 = vpop.f32.mrf.mxu0  ;;  %v1859_v39 = vadd.f32 %v1858_v15, %v1569_v14  ;;  %v1848_v14 = vadd.f32 %v1847_v3, %v1558_v62  ;;  %v1840_v62 = vadd.f32 %v1839_v0, %v1550_v16  ;;  %v2185_v16 = vmax.f32 %v2121_v1, 0.0  ;;  %v2461_v1 = vld [vmem:[#allocation15 + $0x58] sm:$0xff] }
 0x250   :  { %v1860_v52 = vpop.f32.mrf.mxu1  ;;  %v1843_v18 = vadd.f32 %v1842_v56, %v1553_v17  ;;  %v1835_v17 = vadd.f32 %v3658_v44, %v3656_v6  ;;  %v1832_v0 = vadd.f32 %v3654_v38, %v3652_v26  ;;  %v2184_v6 = vmax.f32 %v2120_v13, 0.0  ;;  %v2456_v13 = vld [vmem:[#allocation15 + $0x30] sm:$0xff] }
 0x251   :  { %v1574_v54 = vpop.f32.mrf.mxu0  ;;  %v2139_v2 = vadd.f32 %v3530_v27, %v1859_v39  ;;  %v2136_v3 = vadd.f32 %v3530_v27, %v1848_v14  ;;  %v2202_v52 = vmax.f32 %v2138_v10, 0.0  ;;  %v1827_v44 = vadd.f32 %v3650_v48, %v3648_v37 }
 0x252   :  { %v1863_v21 = vpop.f32.mrf.mxu1  ;;  %v2135_v56 = vadd.f32 %v3530_v27, %v1843_v18  ;;  %v2183_v26 = vmax.f32 %v2119_v22, 0.0  ;;  %v2132_v38 = vadd.f32 %v3530_v27, %v1832_v0  ;;  %v2191_v14 = vmax.f32 %v2127_v41, 0.0  ;;  %v2464_v18 = vld [vmem:[#allocation15 + $0x70] sm:$0xff] }
 0x253   :  { %v1576_v33 = vpop.f32.mrf.mxu0  ;;  %v1864_v46 = vadd.f32 %v1863_v21, %v1574_v54  ;;  %v2203_v63 = vmax.f32 %v2139_v2, 0.0  ;;  %v2186_v54 = vmax.f32 %v2122_v8, 0.0  ;;  %v2201_v21 = vmax.f32 %v2137_v55, 0.0  ;;  %v2357_v8 = vld [vmem:[#allocation13] sm:$0xff]  ;;  %v2463_v55 = vld [vmem:[#allocation15 + $0x68] sm:$0xff] }
 0x254   :  { %v1865_v28 = vpop.f32.mrf.mxu1  ;;  %v2134_v33 = vadd.f32 %v3530_v27, %v1840_v62  ;;  %v2200_v51 = vmax.f32 %v2136_v3, 0.0  ;;  %v2199_v11 = vmax.f32 %v2135_v56, 0.0  ;;  %v2131_v37 = vadd.f32 %v3530_v27, %v1827_v44  ;;  %v2459_v62 = vld [vmem:[#allocation15 + $0x48] sm:$0xff]  ;;  %v2458_v3 = vld [vmem:[#allocation15 + $0x40] sm:$0xff]  ;;  %v2453_v56 = vld [vmem:[#allocation15 + $0x18] sm:$0xff] }
 0x255   :  { %v1577_v32 = vpop.f32.mrf.mxu0  ;;  %v2140_v61 = vadd.f32 %v3530_v27, %v1864_v46  ;;  %v2118_v28 = vadd.f32 %v3530_v27, %v3609_v30  ;;  %v2133_v46 = vadd.f32 %v3530_v27, %v1835_v17  ;;  %v2116_v30 = vadd.f32 %v3530_v27, %v3599_v31  ;;  %v2454_v17 = vld [vmem:[#allocation15 + $0x20] sm:$0xff]  ;;  %v2451_v44 = vld [vmem:[#allocation15 + $0x8] sm:$0xff] }
 0x256   :  { %v1866_v34 = vpop.f32.mrf.mxu1  ;;  %v2196_v49 = vmax.f32 %v2132_v38, 0.0  ;;  %v2193_v2 = vmax.f32 %v2129_v35, 0.0 }
 0x257   :  { %v1867_v40 = vadd.f32 %v1866_v34, %v1577_v32  ;;  %v1579_v23 = vpop.f32.mrf.mxu0  ;;  %v2204_v15 = vmax.f32 %v2140_v61, 0.0  ;;  %v2117_v32 = vadd.f32 %v3530_v27, %v3607_v36  ;;  %v2198_v34 = vmax.f32 %v2134_v33, 0.0 }
 0x258   :  { %v1868_v50 = vpop.f32.mrf.mxu1  ;;  %v2182_v39 = vmax.f32 %v2118_v28, 0.0  ;;  %v2197_v48 = vmax.f32 %v2133_v46, 0.0  ;;  %v2130_v36 = vadd.f32 %v3530_v27, %v3646_v20  ;;  %v2180_v31 = vmax.f32 %v2116_v30, 0.0  ;;  %v2450_v46 = vld [vmem:[#allocation15] sm:$0xff] }
 0x259   :  { %v2141_v58 = vadd.f32 %v3530_v27, %v1867_v40  ;;  %v2115_v40 = vadd.f32 %v3530_v27, %v3589_v45  ;;  %v2181_v23 = vmax.f32 %v2117_v32, 0.0  ;;  %v2114_v50 = vadd.f32 %v3530_v27, %v3579_v47 }
 0x25a   :  { %v2195_v61 = vmax.f32 %v2131_v37, 0.0  ;;  %v2113_v45 = vadd.f32 %v3530_v27, %v3571_v5  ;;  %v2128_v20 = vadd.f32 %v3530_v27, %v3642_v57  ;;  %v2194_v29 = vmax.f32 %v2130_v36, 0.0 }
 0x25b   :  { %v2205_v24 = vmax.f32 %v2141_v58, 0.0  ;;  %v2179_v58 = vmax.f32 %v2115_v40, 0.0  ;;  %v2112_v47 = vadd.f32 %v3530_v27, %v3559_v43  ;;  %v2178_v53 = vmax.f32 %v2114_v50, 0.0 }
 0x25c   :  { %v2111_v5 = vadd.f32 %v3530_v27, %v3547_v19  ;;  %v2126_v57 = vadd.f32 %v3530_v27, %v3638_v9  ;;  %v2192_v59 = vmax.f32 %v2128_v20, 0.0  ;;  %v2110_v43 = vadd.f32 %v3530_v27, %v3539_v4  ;;  %v2209_v19 = vld [vmem:[#allocation12 + $0x10] sm:$0xff]  ;;  %v2360_v9 = vld [vmem:[#allocation13 + $0x18] sm:$0xff]  ;;  %v2358_v4 = vld [vmem:[#allocation13 + $0x8] sm:$0xff] }
 0x25d   :  { %2778 = vmatprep.subr.mxu1 %v2205_v24  ;;  %v2177_v24 = vmax.f32 %v2113_v45, 0.0  ;;  %2872 = vmatpush3.msra.mxu0 %v2360_v9  ;;  %v2359_v27 = vld [vmem:[#allocation13 + $0x10] sm:$0xff] }
 0x25e   :  { %2779 = vmatpush3.msra.mxu1 %v2189_v60  ;;  %v2176_v60 = vmax.f32 %v2112_v47, 0.0  ;;  %v2175_v7 = vmax.f32 %v2111_v5, 0.0  ;;  %v2190_v10 = vmax.f32 %v2126_v57, 0.0  ;;  %2873 = vmatprep.subr.mxu0 %v3300_v25 }
 0x25f   :  { %2780 = vmatprep.subr.mxu1 %v2204_v15  ;;  %v2174_v15 = vmax.f32 %v2110_v43, 0.0  ;;  %2874 = vmatpush3.msra.mxu0 %v2359_v27 }
 0x260   :  { %2781 = vmatpush3.msra.mxu1 %v2188_v12  ;;  %2875 = vmatprep.subr.mxu0 %v3300_v25  ;;  %v2465_v12 = vld [vmem:[#allocation15 + $0x78] sm:$0xff] }
 0x261   :  { %2782 = vmatprep.subr.mxu1 %v2203_v63  ;;  %2876 = vmatpush3.msra.mxu0 %v2358_v4  ;;  %v2462_v63 = vld [vmem:[#allocation15 + $0x60] sm:$0xff] }
 0x262   :  { %2783 = vmatpush3.msra.mxu1 %v2187_v42  ;;  %2877 = vmatprep.subr.mxu0 %v3300_v25  ;;  %v2460_v42 = vld [vmem:[#allocation15 + $0x50] sm:$0xff] }
 0x263   :  { %2784 = vmatprep.subr.mxu1 %v2202_v52  ;;  %2878 = vmatpush3.msra.mxu0 %v2357_v8  ;;  %v2457_v52 = vld [vmem:[#allocation15 + $0x38] sm:$0xff] }
 0x264   :  { %2785 = vmatpush3.msra.mxu1 %v2186_v54  ;;  %v2455_v54 = vld [vmem:[#allocation15 + $0x28] sm:$0xff] }
 0x265   :  { %2786 = vmatprep.subr.mxu1 %v2201_v21  ;;  %v2452_v21 = vld [vmem:[#allocation15 + $0x10] sm:$0xff] }
 0x266   :  { %2787 = vmatpush3.msra.mxu1 %v2185_v16 }
 0x267   :  { %2788 = vmatprep.subr.mxu1 %v2200_v51 }
 0x268   :  { %2789 = vmatpush3.msra.mxu1 %v2184_v6 }
 0x269   :  { %2790 = vmatprep.subr.mxu1 %v2199_v11  ;;  %v2739_v11 = vld [vmem:[%s3756_s7] ss:$0 sm:$0xff] }
 0x26a   :  { %2791 = vmatpush3.msra.mxu1 %v2183_v26 }
 0x26b   :  { %2792 = vmatprep.subr.mxu1 %v2198_v34  ;;  %v2740_v34 = vld [vmem:[%s3758_s9] ss:$0 sm:$0xff] }
 0x26c   :  { %2793 = vmatpush3.msra.mxu1 %v2182_v39 }
 0x26d   :  { %2794 = vmatprep.subr.mxu1 %v2197_v48 }
 0x26e   :  { %2795 = vmatpush3.msra.mxu1 %v2181_v23 }
 0x26f   :  { %2796 = vmatprep.subr.mxu1 %v2196_v49 }
 0x270   :  { %2797 = vmatpush3.msra.mxu1 %v2180_v31 }
 0x271   :  { %2798 = vmatprep.subr.mxu1 %v2195_v61 }
 0x272   :  { %2799 = vmatpush3.msra.mxu1 %v2179_v58 }
 0x273   :  { %2800 = vmatprep.subr.mxu1 %v2194_v29 }
 0x274   :  { %2801 = vmatpush3.msra.mxu1 %v2178_v53 }
 0x275   :  { %2802 = vmatprep.subr.mxu1 %v2193_v2 }
 0x276   :  { %2803 = vmatpush3.msra.mxu1 %v2177_v24 }
 0x277   :  { %2804 = vmatprep.subr.mxu1 %v2192_v59 }
 0x278   :  { %2805 = vmatpush3.msra.mxu1 %v2176_v60 }
 0x279   :  { %2806 = vmatprep.subr.mxu1 %v2191_v14 }
 0x27a   :  { %2807 = vmatpush3.msra.mxu1 %v2175_v7 }
 0x27b   :  { %2808 = vmatprep.subr.mxu1 %v2190_v10 }
 0x27c   :  { %2809 = vmatpush3.msra.mxu1 %v2174_v15 }
 0x27d   :  { %2346 = vmatmul.mubr.f32.vlgmr.msra.gmra.mxu1 %v2209_v19  ;;  %2882 = vmatprep.subr.mxu1 %v3300_v25 }
 0x27e   :  { %2914 = vmatprep.mubr.msk.f32.mxu1 %vm3301_vm0, %v3300_v25  ;;  %2883 = vmatpush3.msra.mxu1 %v2465_v12 }
 0x27f   :  { %2884 = vmatprep.subr.mxu1 %v3300_v25 }
 0x280   :  { %2885 = vmatpush3.msra.mxu1 %v2464_v18 }
 0x281   :  { %2886 = vmatprep.subr.mxu1 %v3300_v25 }
 0x282   :  { %2887 = vmatpush3.msra.mxu1 %v2463_v55 }
 0x283   :  { %2888 = vmatprep.subr.mxu1 %v3300_v25 }
 0x284   :  { %2889 = vmatpush3.msra.mxu1 %v2462_v63 }
 0x285   :  { %2890 = vmatprep.subr.mxu1 %v3300_v25 }
 0x286   :  { %2891 = vmatpush3.msra.mxu1 %v2461_v1 }
 0x287   :  { %2892 = vmatprep.subr.mxu1 %v3300_v25 }
 0x288   :  { %2893 = vmatpush3.msra.mxu1 %v2460_v42 }
 0x289   :  { %2894 = vmatprep.subr.mxu1 %v3300_v25 }
 0x28a   :  { %2895 = vmatpush3.msra.mxu1 %v2459_v62 }
 0x28b   :  { %2896 = vmatprep.subr.mxu1 %v3300_v25 }
 0x28c   :  { %2897 = vmatpush3.msra.mxu1 %v2458_v3 }
 0x28d   :  { %2898 = vmatprep.subr.mxu1 %v3300_v25 }
 0x28e   :  { %2899 = vmatpush3.msra.mxu1 %v2457_v52 }
 0x28f   :  { %2900 = vmatprep.subr.mxu1 %v3300_v25 }
 0x290   :  { %2901 = vmatpush3.msra.mxu1 %v2456_v13 }
 0x291   :  { %2902 = vmatprep.subr.mxu1 %v3300_v25 }
 0x292   :  { %2903 = vmatpush3.msra.mxu1 %v2455_v54 }
 0x293   :  { %2904 = vmatprep.subr.mxu1 %v3300_v25 }
 0x294   :  { %2905 = vmatpush3.msra.mxu1 %v2454_v17 }
 0x295   :  { %2906 = vmatprep.subr.mxu1 %v3300_v25 }
 0x296   :  { %2907 = vmatpush3.msra.mxu1 %v2453_v56 }
 0x297   :  { %2908 = vmatprep.subr.mxu1 %v3300_v25 }
 0x298   :  { %2909 = vmatpush3.msra.mxu1 %v2452_v21 }
 0x299   :  { %2910 = vmatprep.subr.mxu1 %v3300_v25 }
 0x29a   :  { %2911 = vmatpush3.msra.mxu1 %v2451_v44 }
 0x29b   :  { %2912 = vmatprep.subr.mxu1 %v3300_v25 }
 0x29c   :  { %2913 = vmatpush3.msra.mxu1 %v2450_v46 }
 0x2bd   :  { %v2775_v22 = vpop.f32.mrf.mxu0 }
 0x2bf   :  { %v2776_v0 = vpop.f32.mrf.mxu0 }
 0x2c0   :  { %v2777_v51 = vadd.f32 %v2776_v0, %v2775_v22 }
 0x33d   :  { %v2810_v16 = vpop.f32.mrf.mxu1 }
 0x33f   :  { %v2811_v33 = vpop.f32.mrf.mxu1 }
 0x340   :  { %v2812_v28 = vadd.f32 %v2811_v33, %v2810_v16 }
 0x342   :  { %v2348_v6 = vadd.f32 %v2812_v28, %v2777_v51 }
 0x344   :  { %2880 = vmatmul.mubr.f32.vlgmr.msra.gmra.mxu0 %v2348_v6 }
 0x404   :  { %v2446_v32 = vpop.f32.mrf.mxu0 }
 0x405   :  { %v2447_v26 = vadd.f32 %v2739_v11, %v2446_v32 }
 0x406   :  { %v2881_v38 = vpop.f32.mrf.mxu0 }
 0x407   :  { %2915 = vmatmul.mubr.f32.vlgmr.msra.gmra.mxu1 %v2447_v26 }
 0x4c7   :  { %v2539_v30 = vpop.f32.mrf.mxu1 }
 0x4c8   :  { %v2540_v39 = vadd.f32 %v2740_v34, %v2539_v30 }
 0x4c9   :  { %v2916_v25 = vpop.f32.mrf.mxu1 }
 0x4ca   :  { %2543 = vst [vmem:[#allocation16] sm:$0xff] %v2540_v39 }
 0x4cb   :  { %3271 = shalt.err (!%p3268_p11)
}
 0x4cc   :  { %2553 = dma.vmem_to_hbm [thread:$0]  %s2551_s12, 128, %s3759_s10, [#allocation9]  }
 0x4cd   :  { %3286 = dma.done.wait [#allocation9], 128  }
 0x4ce   :  { %3287 = vsyncadd [#allocation9], 4294967168 }
 0x4cf   :  { %2557 = vsyncpa [#allocation8], 1 }
 0x4d0   :  { %2558 = vsyncpa [#allocation11], 1 }
 0x4d1   :  { %2559 = vsyncpa [#allocation14], 1 }
 0x4d2   :  { %2560 = vsyncpa [#allocation9], 1 }

</bundles_post_ra>
